<compile_context>
chip_gen: v7x
topology: tpu7x:2x2x1
jax: 0.10.0
libtpu: 0.0.40
codegen_flags: <defaults>
</compile_context>

<pallas_src>
import functools
import math

import jax
import jax.numpy as jnp
from jax.experimental import pallas as pl
from jax.experimental.pallas import tpu as pltpu


# ----------------------------------------------------------------------------
# In-kernel math helpers
# ----------------------------------------------------------------------------
def _layer_norm(x, a, b, eps):
    # x: (S, D); a, b: (1, D).  Matches torch: unbiased std, divide by (std+eps).
    d = x.shape[-1]
    mean = jnp.mean(x, axis=-1, keepdims=True)
    diff = x - mean
    var = jnp.sum(diff * diff, axis=-1, keepdims=True) / (d - 1)
    std = jnp.sqrt(var)
    return a * diff / (std + eps) + b


def _attention_all_heads(q, k, v, bias, scale, h):
    # q: (Sq, D); k, v: (Sk, D); bias: (Sq, Sk) additive (0 or -1e9).
    sq, d = q.shape
    sk = k.shape[0]
    dk = d // h
    qh = q.reshape(sq, h, dk)
    kh = k.reshape(sk, h, dk)
    vh = v.reshape(sk, h, dk)
    # (H, Sq, Sk): contract dk directly, no materialized transpose of K.
    scores = jnp.einsum("qhd,khd->hqk", qh, kh,
                        preferred_element_type=jnp.float32) * scale
    scores = scores + bias[None, :, :]
    scores = scores - jnp.max(scores, axis=-1, keepdims=True)
    p = jnp.exp(scores)
    p = p / jnp.sum(p, axis=-1, keepdims=True)
    ctx = jnp.einsum("hqk,khd->qhd", p, vh,
                     preferred_element_type=jnp.float32)
    return ctx.reshape(sq, d)


# ----------------------------------------------------------------------------
# Fused sublayer kernels (one pallas_call per sublayer)
# ----------------------------------------------------------------------------
def _self_attn_sublayer_kernel(x_ref, bias_ref, a_ref, b_ref,
                               wqkv_ref, bqkv_ref, wo_ref, bo_ref,
                               o_ref, *, h, eps, scale):
    # x_ref: (1, Sq, D); bias_ref: (1, Sq, Sq); wqkv: (D, 3D)
    x = x_ref[0].astype(jnp.float32)                       # (Sq, D)
    d = x.shape[-1]

    n = _layer_norm(x, a_ref[...], b_ref[...], eps)

    qkv = jnp.dot(n, wqkv_ref[...],
                  preferred_element_type=jnp.float32) + bqkv_ref[...]
    q = qkv[:, :d]
    k = qkv[:, d:2 * d]
    v = qkv[:, 2 * d:]

    ctx = _attention_all_heads(q, k, v, bias_ref[0], scale, h)
    out = jnp.dot(ctx, wo_ref[...],
                  preferred_element_type=jnp.float32) + bo_ref[...]
    o_ref[0] = (x + out).astype(o_ref.dtype)               # fused residual add


def _src_attn_sublayer_kernel(x_ref, mem_ref, bias_ref, a_ref, b_ref,
                              wq_ref, bq_ref, wkv_ref, bkv_ref, wo_ref, bo_ref,
                              o_ref, *, h, eps, scale):
    # x_ref: (1, Sq, D); mem_ref: (1, Sk, D); bias_ref: (1, Sq, Sk)
    x = x_ref[0].astype(jnp.float32)                       # (Sq, D)
    m = mem_ref[0].astype(jnp.float32)                     # (Sk, D)
    d = x.shape[-1]

    n = _layer_norm(x, a_ref[...], b_ref[...], eps)

    q = jnp.dot(n, wq_ref[...],
                preferred_element_type=jnp.float32) + bq_ref[...]
    kv = jnp.dot(m, wkv_ref[...],
                 preferred_element_type=jnp.float32) + bkv_ref[...]
    k = kv[:, :d]
    v = kv[:, d:]

    ctx = _attention_all_heads(q, k, v, bias_ref[0], scale, h)
    out = jnp.dot(ctx, wo_ref[...],
                  preferred_element_type=jnp.float32) + bo_ref[...]
    o_ref[0] = (x + out).astype(o_ref.dtype)               # fused residual add


def _ffn_sublayer_kernel(x_ref, a_ref, b_ref, w1_ref, b1_ref, w2_ref, b2_ref,
                         o_ref, *, eps):
    # PositionwiseFeedForward: w2 @ relu(w1 @ LN(x) + b1) + b2, plus residual.
    x = x_ref[0].astype(jnp.float32)                       # (S, D)
    n = _layer_norm(x, a_ref[...], b_ref[...], eps)
    hdn = jnp.dot(n, w1_ref[...],
                  preferred_element_type=jnp.float32) + b1_ref[...]
    hdn = jnp.maximum(hdn, 0.0)
    out = jnp.dot(hdn, w2_ref[...],
                  preferred_element_type=jnp.float32) + b2_ref[...]
    o_ref[0] = (x + out).astype(o_ref.dtype)               # fused residual add


# ----------------------------------------------------------------------------
# pallas_call wrappers
# ----------------------------------------------------------------------------
_PARALLEL_BATCH = pltpu.CompilerParams(dimension_semantics=("parallel",))


def self_attn_sublayer(x, bias, ln_a, ln_b, p, h, eps=1e-6):
    B, Sq, D = x.shape
    scale = 1.0 / math.sqrt(D // h)                        # Python float (no capture)
    kernel = functools.partial(_self_attn_sublayer_kernel, h=h, eps=eps, scale=scale)
    return pl.pallas_call(
        kernel,
        out_shape=jax.ShapeDtypeStruct((B, Sq, D), x.dtype),
        grid=(B,),
        in_specs=[
            pl.BlockSpec((1, Sq, D), lambda b: (b, 0, 0)),
            pl.BlockSpec((1, Sq, Sq), lambda b: (b, 0, 0)),
            pl.BlockSpec((1, D), lambda b: (0, 0)),
            pl.BlockSpec((1, D), lambda b: (0, 0)),
            pl.BlockSpec((D, 3 * D), lambda b: (0, 0)),
            pl.BlockSpec((1, 3 * D), lambda b: (0, 0)),
            pl.BlockSpec((D, D), lambda b: (0, 0)),
            pl.BlockSpec((1, D), lambda b: (0, 0)),
        ],
        out_specs=pl.BlockSpec((1, Sq, D), lambda b: (b, 0, 0)),
        compiler_params=_PARALLEL_BATCH,
    )(x, bias, ln_a.reshape(1, D), ln_b.reshape(1, D),
      p["wqkv"], p["bqkv"].reshape(1, 3 * D), p["wo"], p["bo"].reshape(1, D))


def src_attn_sublayer(x, memory, bias, ln_a, ln_b, p, h, eps=1e-6):
    B, Sq, D = x.shape
    Sk = memory.shape[1]
    scale = 1.0 / math.sqrt(D // h)
    kernel = functools.partial(_src_attn_sublayer_kernel, h=h, eps=eps, scale=scale)
    return pl.pallas_call(
        kernel,
        out_shape=jax.ShapeDtypeStruct((B, Sq, D), x.dtype),
        grid=(B,),
        in_specs=[
            pl.BlockSpec((1, Sq, D), lambda b: (b, 0, 0)),
            pl.BlockSpec((1, Sk, D), lambda b: (b, 0, 0)),
            pl.BlockSpec((1, Sq, Sk), lambda b: (b, 0, 0)),
            pl.BlockSpec((1, D), lambda b: (0, 0)),
            pl.BlockSpec((1, D), lambda b: (0, 0)),
            pl.BlockSpec((D, D), lambda b: (0, 0)),
            pl.BlockSpec((1, D), lambda b: (0, 0)),
            pl.BlockSpec((D, 2 * D), lambda b: (0, 0)),
            pl.BlockSpec((1, 2 * D), lambda b: (0, 0)),
            pl.BlockSpec((D, D), lambda b: (0, 0)),
            pl.BlockSpec((1, D), lambda b: (0, 0)),
        ],
        out_specs=pl.BlockSpec((1, Sq, D), lambda b: (b, 0, 0)),
        compiler_params=_PARALLEL_BATCH,
    )(x, memory, bias, ln_a.reshape(1, D), ln_b.reshape(1, D),
      p["wq"], p["bq"].reshape(1, D),
      p["wkv"], p["bkv"].reshape(1, 2 * D),
      p["wo"], p["bo"].reshape(1, D))


def ffn_sublayer(x, ln_a, ln_b, p, eps=1e-6):
    B, S, D = x.shape
    Dff = p["w1"].shape[1]
    kernel = functools.partial(_ffn_sublayer_kernel, eps=eps)
    return pl.pallas_call(
        kernel,
        out_shape=jax.ShapeDtypeStruct((B, S, D), x.dtype),
        grid=(B,),
        in_specs=[
            pl.BlockSpec((1, S, D), lambda b: (b, 0, 0)),
            pl.BlockSpec((1, D), lambda b: (0, 0)),
            pl.BlockSpec((1, D), lambda b: (0, 0)),
            pl.BlockSpec((D, Dff), lambda b: (0, 0)),
            pl.BlockSpec((1, Dff), lambda b: (0, 0)),
            pl.BlockSpec((Dff, D), lambda b: (0, 0)),
            pl.BlockSpec((1, D), lambda b: (0, 0)),
        ],
        out_specs=pl.BlockSpec((1, S, D), lambda b: (b, 0, 0)),
        compiler_params=_PARALLEL_BATCH,
    )(x, ln_a.reshape(1, D), ln_b.reshape(1, D),
      p["w1"], p["b1"].reshape(1, Dff), p["w2"], p["b2"].reshape(1, D))


def decoder_layer_forward(params, x, memory, src_mask, tgt_mask, h):
    B, Sq, D = x.shape
    Sk = memory.shape[1]
    # Convert masks to additive f32 bias once (0 where valid, -1e9 where masked).
    tgt_bias = (jnp.broadcast_to(tgt_mask, (B, Sq, Sq)).astype(jnp.float32) - 1.0) * 1e9
    src_bias = (jnp.broadcast_to(src_mask, (B, Sq, Sk)).astype(jnp.float32) - 1.0) * 1e9

    # sublayer 0: self-attention (pre-norm residual), fully fused.
    x = self_attn_sublayer(x, tgt_bias, params["ln0_a"], params["ln0_b"],
                           params["self_attn"], h)
    # sublayer 1: source attention against memory, fully fused.
    x = src_attn_sublayer(x, memory, src_bias, params["ln1_a"], params["ln1_b"],
                          params["src_attn"], h)
    # sublayer 2: position-wise feed forward, fully fused.
    x = ffn_sublayer(x, params["ln2_a"], params["ln2_b"], params["ffn"])
    return x


# ----------------------------------------------------------------------------
# Pure-JAX reference (mirrors the PyTorch module) for a correctness check
# ----------------------------------------------------------------------------
def reference_forward(params, x, memory, src_mask, tgt_mask, h, eps=1e-6):
    def ln(y, a, b):
        mean = y.mean(-1, keepdims=True)
        var = ((y - mean) ** 2).sum(-1, keepdims=True) / (y.shape[-1] - 1)
        return a * (y - mean) / (jnp.sqrt(var) + eps) + b

    def mha(q_in, kv_in, mask, wq, bq, wk, bk, wv, bv, wo, bo):
        B, Sq, D = q_in.shape
        Sk = kv_in.shape[1]
        dk = D // h
        qh = (q_in @ wq + bq).reshape(B, Sq, h, dk).transpose(0, 2, 1, 3)
        kh = (kv_in @ wk + bk).reshape(B, Sk, h, dk).transpose(0, 2, 1, 3)
        vh = (kv_in @ wv + bv).reshape(B, Sk, h, dk).transpose(0, 2, 1, 3)
        scores = jnp.einsum("bhqd,bhkd->bhqk", qh, kh) / math.sqrt(dk)
        mask_b = jnp.broadcast_to(mask, (B, Sq, Sk))[:, None, :, :]
        scores = jnp.where(mask_b == 0, -1e9, scores)
        p = jax.nn.softmax(scores, axis=-1)
        ctx = jnp.einsum("bhqk,bhkd->bhqd", p, vh).transpose(0, 2, 1, 3).reshape(B, Sq, D)
        return ctx @ wo + bo

    D = x.shape[-1]
    sa = params["self_attn"]
    n0 = ln(x, params["ln0_a"], params["ln0_b"])
    x = x + mha(n0, n0, tgt_mask,
                sa["wqkv"][:, :D], sa["bqkv"][:D],
                sa["wqkv"][:, D:2 * D], sa["bqkv"][D:2 * D],
                sa["wqkv"][:, 2 * D:], sa["bqkv"][2 * D:],
                sa["wo"], sa["bo"])
    ca = params["src_attn"]
    n1 = ln(x, params["ln1_a"], params["ln1_b"])
    x = x + mha(n1, memory, src_mask,
                ca["wq"], ca["bq"],
                ca["wkv"][:, :D], ca["bkv"][:D],
                ca["wkv"][:, D:], ca["bkv"][D:],
                ca["wo"], ca["bo"])
    fp = params["ffn"]
    n2 = ln(x, params["ln2_a"], params["ln2_b"])
    x = x + (jnp.maximum(n2 @ fp["w1"] + fp["b1"], 0.0) @ fp["w2"] + fp["b2"])
    return x


# ----------------------------------------------------------------------------
# Deterministic parameter construction (synthetic — no checkpoint)
# ----------------------------------------------------------------------------
def init_params(key, d_model, d_ff):
    ks = list(jax.random.split(key, 4))

    def lin(k, din, dout):
        kw, kb = jax.random.split(k)
        return (0.05 * jax.random.normal(kw, (din, dout), jnp.float32),
                0.05 * jax.random.normal(kb, (dout,), jnp.float32))

    def mha_self(k):
        k1, k2, k3, k4 = jax.random.split(k, 4)
        wq, bq = lin(k1, d_model, d_model)
        wk, bk = lin(k2, d_model, d_model)
        wv, bv = lin(k3, d_model, d_model)
        wo, bo = lin(k4, d_model, d_model)
        return dict(wqkv=jnp.concatenate([wq, wk, wv], axis=1),
                    bqkv=jnp.concatenate([bq, bk, bv], axis=0),
                    wo=wo, bo=bo)

    def mha_src(k):
        k1, k2, k3, k4 = jax.random.split(k, 4)
        wq, bq = lin(k1, d_model, d_model)
        wk, bk = lin(k2, d_model, d_model)
        wv, bv = lin(k3, d_model, d_model)
        wo, bo = lin(k4, d_model, d_model)
        return dict(wq=wq, bq=bq,
                    wkv=jnp.concatenate([wk, wv], axis=1),
                    bkv=jnp.concatenate([bk, bv], axis=0),
                    wo=wo, bo=bo)

    w1, b1 = lin(ks[0], d_model, d_ff)
    w2, b2 = lin(ks[1], d_ff, d_model)
    return {
        "self_attn": mha_self(ks[2]),
        "src_attn": mha_src(ks[3]),
        "ffn": dict(w1=w1, b1=b1, w2=w2, b2=b2),
        "ln0_a": jnp.ones((d_model,), jnp.float32),
        "ln0_b": jnp.zeros((d_model,), jnp.float32),
        "ln1_a": jnp.ones((d_model,), jnp.float32),
        "ln1_b": jnp.zeros((d_model,), jnp.float32),
        "ln2_a": jnp.ones((d_model,), jnp.float32),
        "ln2_b": jnp.zeros((d_model,), jnp.float32),
    }


# ----------------------------------------------------------------------------
if __name__ == "__main__":
    B, S_TGT, S_SRC = 2, 8, 16
    D_MODEL, H, D_FF = 32, 4, 64

    key = jax.random.PRNGKey(0)
    kx, km, kp = jax.random.split(key, 3)

    x = jax.random.normal(kx, (B, S_TGT, D_MODEL), jnp.float32)
    memory = jax.random.normal(km, (B, S_SRC, D_MODEL), jnp.float32)

    # tgt_mask: causal (subsequent) mask, (B, S_tgt, S_tgt)
    tgt_mask = jnp.tril(jnp.ones((S_TGT, S_TGT), jnp.int32))[None, :, :].repeat(B, axis=0)
    # src_mask: all valid, (B, 1, S_src)
    src_mask = jnp.ones((B, 1, S_SRC), jnp.int32)

    params = init_params(kp, D_MODEL, D_FF)

    fwd = jax.jit(functools.partial(decoder_layer_forward, h=H))
    out = fwd(params, x, memory, src_mask, tgt_mask)
    out = jax.block_until_ready(out)

    ref = reference_forward(params, x, memory, src_mask, tgt_mask, H)

    assert out.shape == (B, S_TGT, D_MODEL)
    assert jnp.all(jnp.isfinite(out))
    assert jnp.allclose(out, ref, rtol=2e-4, atol=2e-4), (
        f"max abs err {jnp.max(jnp.abs(out - ref))}")
    print("KERNEL_OK")
</pallas_src>

<mosaic_0001>
module attributes {stable_mosaic.version = 11 : i64} {
  func.func @_self_attn_sublayer_kernel(%arg0: i32, %arg1: memref<1x8x32xf32, #tpu.memory_space<vmem>>, %arg2: memref<1x8x8xf32, #tpu.memory_space<vmem>>, %arg3: memref<1x32xf32, #tpu.memory_space<vmem>>, %arg4: memref<1x32xf32, #tpu.memory_space<vmem>>, %arg5: memref<32x96xf32, #tpu.memory_space<vmem>>, %arg6: memref<1x96xf32, #tpu.memory_space<vmem>>, %arg7: memref<32x32xf32, #tpu.memory_space<vmem>>, %arg8: memref<1x32xf32, #tpu.memory_space<vmem>>, %arg9: memref<1x8x32xf32, #tpu.memory_space<vmem>>) attributes {dimension_semantics = [#tpu.dimension_semantics<parallel>], iteration_bounds = array<i64: 2>, scalar_prefetch = 0 : i64, scratch_operands = 0 : i64, tpu.core_type = #tpu.core_type<tc>, window_params = [{transform_indices = @transform_0, window_bounds = array<i64: 1, 8, 32>}, {transform_indices = @transform_1, window_bounds = array<i64: 1, 8, 8>}, {pipeline_mode = #tpu.pipeline_mode<synchronous>, transform_indices = @transform_2, window_bounds = array<i64: 1, 32>}, {pipeline_mode = #tpu.pipeline_mode<synchronous>, transform_indices = @transform_3, window_bounds = array<i64: 1, 32>}, {pipeline_mode = #tpu.pipeline_mode<synchronous>, transform_indices = @transform_4, window_bounds = array<i64: 32, 96>}, {pipeline_mode = #tpu.pipeline_mode<synchronous>, transform_indices = @transform_5, window_bounds = array<i64: 1, 96>}, {pipeline_mode = #tpu.pipeline_mode<synchronous>, transform_indices = @transform_6, window_bounds = array<i64: 32, 32>}, {pipeline_mode = #tpu.pipeline_mode<synchronous>, transform_indices = @transform_7, window_bounds = array<i64: 1, 32>}, {transform_indices = @transform_8, window_bounds = array<i64: 1, 8, 32>}]} {
    %c0 = arith.constant 0 : index
    %c0_0 = arith.constant 0 : index
    %c0_1 = arith.constant 0 : index
    %0 = vector.load %arg1[%c0, %c0_0, %c0_1] : memref<1x8x32xf32, #tpu.memory_space<vmem>>, vector<1x8x32xf32>
    %1 = vector.shape_cast %0 : vector<1x8x32xf32> to vector<8x32xf32>
    %c0_2 = arith.constant 0 : index
    %c0_3 = arith.constant 0 : index
    %2 = vector.load %arg3[%c0_2, %c0_3] : memref<1x32xf32, #tpu.memory_space<vmem>>, vector<1x32xf32>
    %c0_4 = arith.constant 0 : index
    %c0_5 = arith.constant 0 : index
    %3 = vector.load %arg4[%c0_4, %c0_5] : memref<1x32xf32, #tpu.memory_space<vmem>>, vector<1x32xf32>
    %cst = arith.constant dense<0.000000e+00> : vector<8xf32>
    %4 = vector.multi_reduction <add>, %1, %cst [1] : vector<8x32xf32> to vector<8xf32>
    %5 = vector.shape_cast %4 : vector<8xf32> to vector<8x1xf32>
    %cst_6 = arith.constant 3.200000e+01 : f32
    %6 = vector.broadcast %cst_6 : f32 to vector<8x1xf32>
    %7 = arith.divf %5, %6 : vector<8x1xf32>
    %8 = vector.broadcast %7 : vector<8x1xf32> to vector<8x32xf32>
    %9 = arith.subf %1, %8 : vector<8x32xf32>
    %10 = arith.mulf %9, %9 : vector<8x32xf32>
    %cst_7 = arith.constant dense<0.000000e+00> : vector<8xf32>
    %11 = vector.multi_reduction <add>, %10, %cst_7 [1] : vector<8x32xf32> to vector<8xf32>
    %12 = vector.shape_cast %11 : vector<8xf32> to vector<8x1xf32>
    %cst_8 = arith.constant 3.100000e+01 : f32
    %13 = vector.broadcast %cst_8 : f32 to vector<8x1xf32>
    %14 = arith.divf %12, %13 : vector<8x1xf32>
    %15 = math.sqrt %14 : vector<8x1xf32>
    %16 = vector.broadcast %2 : vector<1x32xf32> to vector<8x32xf32>
    %17 = arith.mulf %16, %9 : vector<8x32xf32>
    %cst_9 = arith.constant 9.99999997E-7 : f32
    %18 = vector.broadcast %cst_9 : f32 to vector<8x1xf32>
    %19 = arith.addf %15, %18 : vector<8x1xf32>
    %20 = vector.broadcast %19 : vector<8x1xf32> to vector<8x32xf32>
    %21 = arith.divf %17, %20 : vector<8x32xf32>
    %22 = vector.broadcast %3 : vector<1x32xf32> to vector<8x32xf32>
    %23 = arith.addf %21, %22 : vector<8x32xf32>
    %c0_10 = arith.constant 0 : index
    %c0_11 = arith.constant 0 : index
    %24 = vector.load %arg5[%c0_10, %c0_11] : memref<32x96xf32, #tpu.memory_space<vmem>>, vector<32x96xf32>
    %cst_12 = arith.constant dense<0.000000e+00> : vector<8x96xf32>
    %25 = tpu.matmul %23, %24, %cst_12 {dimension_numbers = #tpu.dot_dimension_numbers<[1], [0], [0], [1], [0, 0, 1, 1], [], []>} : vector<8x32xf32>, vector<32x96xf32>, vector<8x96xf32> -> vector<8x96xf32>
    %c0_13 = arith.constant 0 : index
    %c0_14 = arith.constant 0 : index
    %26 = vector.load %arg6[%c0_13, %c0_14] : memref<1x96xf32, #tpu.memory_space<vmem>>, vector<1x96xf32>
    %27 = vector.broadcast %26 : vector<1x96xf32> to vector<8x96xf32>
    %28 = arith.addf %25, %27 : vector<8x96xf32>
    %29 = vector.extract_strided_slice %28 {offsets = [0, 0], sizes = [8, 32], strides = [1, 1]} : vector<8x96xf32> to vector<8x32xf32>
    %30 = vector.extract_strided_slice %28 {offsets = [0, 32], sizes = [8, 32], strides = [1, 1]} : vector<8x96xf32> to vector<8x32xf32>
    %31 = vector.extract_strided_slice %28 {offsets = [0, 64], sizes = [8, 32], strides = [1, 1]} : vector<8x96xf32> to vector<8x32xf32>
    %c0_15 = arith.constant 0 : index
    %c0_16 = arith.constant 0 : index
    %c0_17 = arith.constant 0 : index
    %32 = vector.load %arg2[%c0_15, %c0_16, %c0_17] : memref<1x8x8xf32, #tpu.memory_space<vmem>>, vector<1x8x8xf32>
    %33 = vector.shape_cast %32 : vector<1x8x8xf32> to vector<8x8xf32>
    %34 = vector.shape_cast %29 : vector<8x32xf32> to vector<8x4x8xf32>
    %35 = vector.shape_cast %30 : vector<8x32xf32> to vector<8x4x8xf32>
    %36 = vector.shape_cast %31 : vector<8x32xf32> to vector<8x4x8xf32>
    "tpu.trace_start"() <{level = 10 : i32, message = "qhd,khd->hqk"}> : () -> ()
    %cst_18 = arith.constant dense<0.000000e+00> : vector<4x8x8xf32>
    %37 = tpu.matmul %34, %35, %cst_18 {dimension_numbers = #tpu.dot_dimension_numbers<[2], [2], [0], [0], [0, 1, 0, 0, 1, 0], [1], [1]>} : vector<8x4x8xf32>, vector<8x4x8xf32>, vector<4x8x8xf32> -> vector<4x8x8xf32>
    "tpu.trace_stop"() : () -> ()
    %cst_19 = arith.constant 0.353553385 : f32
    %38 = vector.broadcast %cst_19 : f32 to vector<4x8x8xf32>
    %39 = arith.mulf %37, %38 : vector<4x8x8xf32>
    %40 = vector.shape_cast %33 : vector<8x8xf32> to vector<1x8x8xf32>
    %41 = vector.broadcast %40 : vector<1x8x8xf32> to vector<4x8x8xf32>
    %42 = arith.addf %39, %41 : vector<4x8x8xf32>
    %cst_20 = arith.constant dense<0xFF800000> : vector<4x8xf32>
    %43 = vector.multi_reduction <maximumf>, %42, %cst_20 [2] : vector<4x8x8xf32> to vector<4x8xf32>
    %44 = vector.shape_cast %43 : vector<4x8xf32> to vector<4x8x1xf32>
    %45 = vector.broadcast %44 : vector<4x8x1xf32> to vector<4x8x8xf32>
    %46 = arith.subf %42, %45 : vector<4x8x8xf32>
    %47 = math.exp %46 : vector<4x8x8xf32>
    %cst_21 = arith.constant dense<0.000000e+00> : vector<4x8xf32>
    %48 = vector.multi_reduction <add>, %47, %cst_21 [2] : vector<4x8x8xf32> to vector<4x8xf32>
    %49 = vector.shape_cast %48 : vector<4x8xf32> to vector<4x8x1xf32>
    %50 = vector.broadcast %49 : vector<4x8x1xf32> to vector<4x8x8xf32>
    %51 = arith.divf %47, %50 : vector<4x8x8xf32>
    "tpu.trace_start"() <{level = 10 : i32, message = "hqk,khd->qhd"}> : () -> ()
    %cst_22 = arith.constant dense<0.000000e+00> : vector<4x8x8xf32>
    %52 = tpu.matmul %36, %51, %cst_22 {dimension_numbers = #tpu.dot_dimension_numbers<[0], [2], [2], [1], [0, 1, 0, 2, 1, 1], [1], [0]>} : vector<8x4x8xf32>, vector<4x8x8xf32>, vector<4x8x8xf32> -> vector<4x8x8xf32>
    %53 = tpu.transpose %52, [2, 0, 1] : vector<4x8x8xf32> -> vector<8x4x8xf32>
    "tpu.trace_stop"() : () -> ()
    %54 = vector.shape_cast %53 : vector<8x4x8xf32> to vector<8x32xf32>
    %c0_23 = arith.constant 0 : index
    %c0_24 = arith.constant 0 : index
    %55 = vector.load %arg7[%c0_23, %c0_24] : memref<32x32xf32, #tpu.memory_space<vmem>>, vector<32x32xf32>
    %cst_25 = arith.constant dense<0.000000e+00> : vector<8x32xf32>
    %56 = tpu.matmul %54, %55, %cst_25 {dimension_numbers = #tpu.dot_dimension_numbers<[1], [0], [0], [1], [0, 0, 1, 1], [], []>} : vector<8x32xf32>, vector<32x32xf32>, vector<8x32xf32> -> vector<8x32xf32>
    %c0_26 = arith.constant 0 : index
    %c0_27 = arith.constant 0 : index
    %57 = vector.load %arg8[%c0_26, %c0_27] : memref<1x32xf32, #tpu.memory_space<vmem>>, vector<1x32xf32>
    %58 = vector.broadcast %57 : vector<1x32xf32> to vector<8x32xf32>
    %59 = arith.addf %56, %58 : vector<8x32xf32>
    %60 = arith.addf %1, %59 : vector<8x32xf32>
    %c0_28 = arith.constant 0 : index
    %c0_29 = arith.constant 0 : index
    %c0_30 = arith.constant 0 : index
    %61 = vector.load %arg9[%c0_28, %c0_29, %c0_30] : memref<1x8x32xf32, #tpu.memory_space<vmem>>, vector<1x8x32xf32>
    %62 = vector.shape_cast %61 : vector<1x8x32xf32> to vector<8x32xf32>
    %63 = vector.shape_cast %60 : vector<8x32xf32> to vector<1x8x32xf32>
    tpu.vector_store %arg9[%c0_28, %c0_29, %c0_30], %63 {strides = array<i32>} : memref<1x8x32xf32, #tpu.memory_space<vmem>>, vector<1x8x32xf32>,
    return
  }
  func.func @transform_0(%arg0: i32) -> (i32, i32, i32) {
    %c0_i32 = arith.constant 0 : i32
    %c0_i32_0 = arith.constant 0 : i32
    %c0_i32_1 = arith.constant 0 : i32
    return %arg0, %c0_i32, %c0_i32_0 : i32, i32, i32
  }
  func.func @transform_1(%arg0: i32) -> (i32, i32, i32) {
    %c0_i32 = arith.constant 0 : i32
    %c0_i32_0 = arith.constant 0 : i32
    %c0_i32_1 = arith.constant 0 : i32
    return %arg0, %c0_i32, %c0_i32_0 : i32, i32, i32
  }
  func.func @transform_2(%arg0: i32) -> (i32, i32) {
    %c0_i32 = arith.constant 0 : i32
    %c0_i32_0 = arith.constant 0 : i32
    %c0_i32_1 = arith.constant 0 : i32
    return %c0_i32, %c0_i32_0 : i32, i32
  }
  func.func @transform_3(%arg0: i32) -> (i32, i32) {
    %c0_i32 = arith.constant 0 : i32
    %c0_i32_0 = arith.constant 0 : i32
    %c0_i32_1 = arith.constant 0 : i32
    return %c0_i32, %c0_i32_0 : i32, i32
  }
  func.func @transform_4(%arg0: i32) -> (i32, i32) {
    %c0_i32 = arith.constant 0 : i32
    %c0_i32_0 = arith.constant 0 : i32
    %c0_i32_1 = arith.constant 0 : i32
    return %c0_i32, %c0_i32_0 : i32, i32
  }
  func.func @transform_5(%arg0: i32) -> (i32, i32) {
    %c0_i32 = arith.constant 0 : i32
    %c0_i32_0 = arith.constant 0 : i32
    %c0_i32_1 = arith.constant 0 : i32
    return %c0_i32, %c0_i32_0 : i32, i32
  }
  func.func @transform_6(%arg0: i32) -> (i32, i32) {
    %c0_i32 = arith.constant 0 : i32
    %c0_i32_0 = arith.constant 0 : i32
    %c0_i32_1 = arith.constant 0 : i32
    return %c0_i32, %c0_i32_0 : i32, i32
  }
  func.func @transform_7(%arg0: i32) -> (i32, i32) {
    %c0_i32 = arith.constant 0 : i32
    %c0_i32_0 = arith.constant 0 : i32
    %c0_i32_1 = arith.constant 0 : i32
    return %c0_i32, %c0_i32_0 : i32, i32
  }
  func.func @transform_8(%arg0: i32) -> (i32, i32, i32) {
    %c0_i32 = arith.constant 0 : i32
    %c0_i32_0 = arith.constant 0 : i32
    %c0_i32_1 = arith.constant 0 : i32
    return %arg0, %c0_i32, %c0_i32_0 : i32, i32, i32
  }
}

module attributes {stable_mosaic.version = 11 : i64} {
  func.func @_src_attn_sublayer_kernel(%arg0: i32, %arg1: memref<1x8x32xf32, #tpu.memory_space<vmem>>, %arg2: memref<1x16x32xf32, #tpu.memory_space<vmem>>, %arg3: memref<1x8x16xf32, #tpu.memory_space<vmem>>, %arg4: memref<1x32xf32, #tpu.memory_space<vmem>>, %arg5: memref<1x32xf32, #tpu.memory_space<vmem>>, %arg6: memref<32x32xf32, #tpu.memory_space<vmem>>, %arg7: memref<1x32xf32, #tpu.memory_space<vmem>>, %arg8: memref<32x64xf32, #tpu.memory_space<vmem>>, %arg9: memref<1x64xf32, #tpu.memory_space<vmem>>, %arg10: memref<32x32xf32, #tpu.memory_space<vmem>>, %arg11: memref<1x32xf32, #tpu.memory_space<vmem>>, %arg12: memref<1x8x32xf32, #tpu.memory_space<vmem>>) attributes {dimension_semantics = [#tpu.dimension_semantics<parallel>], iteration_bounds = array<i64: 2>, scalar_prefetch = 0 : i64, scratch_operands = 0 : i64, tpu.core_type = #tpu.core_type<tc>, window_params = [{transform_indices = @transform_0, window_bounds = array<i64: 1, 8, 32>}, {transform_indices = @transform_1, window_bounds = array<i64: 1, 16, 32>}, {transform_indices = @transform_2, window_bounds = array<i64: 1, 8, 16>}, {pipeline_mode = #tpu.pipeline_mode<synchronous>, transform_indices = @transform_3, window_bounds = array<i64: 1, 32>}, {pipeline_mode = #tpu.pipeline_mode<synchronous>, transform_indices = @transform_4, window_bounds = array<i64: 1, 32>}, {pipeline_mode = #tpu.pipeline_mode<synchronous>, transform_indices = @transform_5, window_bounds = array<i64: 32, 32>}, {pipeline_mode = #tpu.pipeline_mode<synchronous>, transform_indices = @transform_6, window_bounds = array<i64: 1, 32>}, {pipeline_mode = #tpu.pipeline_mode<synchronous>, transform_indices = @transform_7, window_bounds = array<i64: 32, 64>}, {pipeline_mode = #tpu.pipeline_mode<synchronous>, transform_indices = @transform_8, window_bounds = array<i64: 1, 64>}, {pipeline_mode = #tpu.pipeline_mode<synchronous>, transform_indices = @transform_9, window_bounds = array<i64: 32, 32>}, {pipeline_mode = #tpu.pipeline_mode<synchronous>, transform_indices = @transform_10, window_bounds = array<i64: 1, 32>}, {transform_indices = @transform_11, window_bounds = array<i64: 1, 8, 32>}]} {
    %c0 = arith.constant 0 : index
    %c0_0 = arith.constant 0 : index
    %c0_1 = arith.constant 0 : index
    %0 = vector.load %arg1[%c0, %c0_0, %c0_1] : memref<1x8x32xf32, #tpu.memory_space<vmem>>, vector<1x8x32xf32>
    %1 = vector.shape_cast %0 : vector<1x8x32xf32> to vector<8x32xf32>
    %c0_2 = arith.constant 0 : index
    %c0_3 = arith.constant 0 : index
    %c0_4 = arith.constant 0 : index
    %2 = vector.load %arg2[%c0_2, %c0_3, %c0_4] : memref<1x16x32xf32, #tpu.memory_space<vmem>>, vector<1x16x32xf32>
    %3 = vector.shape_cast %2 : vector<1x16x32xf32> to vector<16x32xf32>
    %c0_5 = arith.constant 0 : index
    %c0_6 = arith.constant 0 : index
    %4 = vector.load %arg4[%c0_5, %c0_6] : memref<1x32xf32, #tpu.memory_space<vmem>>, vector<1x32xf32>
    %c0_7 = arith.constant 0 : index
    %c0_8 = arith.constant 0 : index
    %5 = vector.load %arg5[%c0_7, %c0_8] : memref<1x32xf32, #tpu.memory_space<vmem>>, vector<1x32xf32>
    %cst = arith.constant dense<0.000000e+00> : vector<8xf32>
    %6 = vector.multi_reduction <add>, %1, %cst [1] : vector<8x32xf32> to vector<8xf32>
    %7 = vector.shape_cast %6 : vector<8xf32> to vector<8x1xf32>
    %cst_9 = arith.constant 3.200000e+01 : f32
    %8 = vector.broadcast %cst_9 : f32 to vector<8x1xf32>
    %9 = arith.divf %7, %8 : vector<8x1xf32>
    %10 = vector.broadcast %9 : vector<8x1xf32> to vector<8x32xf32>
    %11 = arith.subf %1, %10 : vector<8x32xf32>
    %12 = arith.mulf %11, %11 : vector<8x32xf32>
    %cst_10 = arith.constant dense<0.000000e+00> : vector<8xf32>
    %13 = vector.multi_reduction <add>, %12, %cst_10 [1] : vector<8x32xf32> to vector<8xf32>
    %14 = vector.shape_cast %13 : vector<8xf32> to vector<8x1xf32>
    %cst_11 = arith.constant 3.100000e+01 : f32
    %15 = vector.broadcast %cst_11 : f32 to vector<8x1xf32>
    %16 = arith.divf %14, %15 : vector<8x1xf32>
    %17 = math.sqrt %16 : vector<8x1xf32>
    %18 = vector.broadcast %4 : vector<1x32xf32> to vector<8x32xf32>
    %19 = arith.mulf %18, %11 : vector<8x32xf32>
    %cst_12 = arith.constant 9.99999997E-7 : f32
    %20 = vector.broadcast %cst_12 : f32 to vector<8x1xf32>
    %21 = arith.addf %17, %20 : vector<8x1xf32>
    %22 = vector.broadcast %21 : vector<8x1xf32> to vector<8x32xf32>
    %23 = arith.divf %19, %22 : vector<8x32xf32>
    %24 = vector.broadcast %5 : vector<1x32xf32> to vector<8x32xf32>
    %25 = arith.addf %23, %24 : vector<8x32xf32>
    %c0_13 = arith.constant 0 : index
    %c0_14 = arith.constant 0 : index
    %26 = vector.load %arg6[%c0_13, %c0_14] : memref<32x32xf32, #tpu.memory_space<vmem>>, vector<32x32xf32>
    %cst_15 = arith.constant dense<0.000000e+00> : vector<8x32xf32>
    %27 = tpu.matmul %25, %26, %cst_15 {dimension_numbers = #tpu.dot_dimension_numbers<[1], [0], [0], [1], [0, 0, 1, 1], [], []>} : vector<8x32xf32>, vector<32x32xf32>, vector<8x32xf32> -> vector<8x32xf32>
    %c0_16 = arith.constant 0 : index
    %c0_17 = arith.constant 0 : index
    %28 = vector.load %arg7[%c0_16, %c0_17] : memref<1x32xf32, #tpu.memory_space<vmem>>, vector<1x32xf32>
    %29 = vector.broadcast %28 : vector<1x32xf32> to vector<8x32xf32>
    %30 = arith.addf %27, %29 : vector<8x32xf32>
    %c0_18 = arith.constant 0 : index
    %c0_19 = arith.constant 0 : index
    %31 = vector.load %arg8[%c0_18, %c0_19] : memref<32x64xf32, #tpu.memory_space<vmem>>, vector<32x64xf32>
    %cst_20 = arith.constant dense<0.000000e+00> : vector<16x64xf32>
    %32 = tpu.matmul %3, %31, %cst_20 {dimension_numbers = #tpu.dot_dimension_numbers<[1], [0], [0], [1], [0, 0, 1, 1], [], []>} : vector<16x32xf32>, vector<32x64xf32>, vector<16x64xf32> -> vector<16x64xf32>
    %c0_21 = arith.constant 0 : index
    %c0_22 = arith.constant 0 : index
    %33 = vector.load %arg9[%c0_21, %c0_22] : memref<1x64xf32, #tpu.memory_space<vmem>>, vector<1x64xf32>
    %34 = vector.broadcast %33 : vector<1x64xf32> to vector<16x64xf32>
    %35 = arith.addf %32, %34 : vector<16x64xf32>
    %36 = vector.extract_strided_slice %35 {offsets = [0, 0], sizes = [16, 32], strides = [1, 1]} : vector<16x64xf32> to vector<16x32xf32>
    %37 = vector.extract_strided_slice %35 {offsets = [0, 32], sizes = [16, 32], strides = [1, 1]} : vector<16x64xf32> to vector<16x32xf32>
    %c0_23 = arith.constant 0 : index
    %c0_24 = arith.constant 0 : index
    %c0_25 = arith.constant 0 : index
    %38 = vector.load %arg3[%c0_23, %c0_24, %c0_25] : memref<1x8x16xf32, #tpu.memory_space<vmem>>, vector<1x8x16xf32>
    %39 = vector.shape_cast %38 : vector<1x8x16xf32> to vector<8x16xf32>
    %40 = vector.shape_cast %30 : vector<8x32xf32> to vector<8x4x8xf32>
    %41 = vector.shape_cast %36 : vector<16x32xf32> to vector<16x4x8xf32>
    %42 = vector.shape_cast %37 : vector<16x32xf32> to vector<16x4x8xf32>
    "tpu.trace_start"() <{level = 10 : i32, message = "qhd,khd->hqk"}> : () -> ()
    %cst_26 = arith.constant dense<0.000000e+00> : vector<4x8x16xf32>
    %43 = tpu.matmul %40, %41, %cst_26 {dimension_numbers = #tpu.dot_dimension_numbers<[2], [2], [0], [0], [0, 1, 0, 0, 1, 0], [1], [1]>} : vector<8x4x8xf32>, vector<16x4x8xf32>, vector<4x8x16xf32> -> vector<4x8x16xf32>
    "tpu.trace_stop"() : () -> ()
    %cst_27 = arith.constant 0.353553385 : f32
    %44 = vector.broadcast %cst_27 : f32 to vector<4x8x16xf32>
    %45 = arith.mulf %43, %44 : vector<4x8x16xf32>
    %46 = vector.shape_cast %39 : vector<8x16xf32> to vector<1x8x16xf32>
    %47 = vector.broadcast %46 : vector<1x8x16xf32> to vector<4x8x16xf32>
    %48 = arith.addf %45, %47 : vector<4x8x16xf32>
    %cst_28 = arith.constant dense<0xFF800000> : vector<4x8xf32>
    %49 = vector.multi_reduction <maximumf>, %48, %cst_28 [2] : vector<4x8x16xf32> to vector<4x8xf32>
    %50 = vector.shape_cast %49 : vector<4x8xf32> to vector<4x8x1xf32>
    %51 = vector.broadcast %50 : vector<4x8x1xf32> to vector<4x8x16xf32>
    %52 = arith.subf %48, %51 : vector<4x8x16xf32>
    %53 = math.exp %52 : vector<4x8x16xf32>
    %cst_29 = arith.constant dense<0.000000e+00> : vector<4x8xf32>
    %54 = vector.multi_reduction <add>, %53, %cst_29 [2] : vector<4x8x16xf32> to vector<4x8xf32>
    %55 = vector.shape_cast %54 : vector<4x8xf32> to vector<4x8x1xf32>
    %56 = vector.broadcast %55 : vector<4x8x1xf32> to vector<4x8x16xf32>
    %57 = arith.divf %53, %56 : vector<4x8x16xf32>
    "tpu.trace_start"() <{level = 10 : i32, message = "hqk,khd->qhd"}> : () -> ()
    %cst_30 = arith.constant dense<0.000000e+00> : vector<4x8x8xf32>
    %58 = tpu.matmul %42, %57, %cst_30 {dimension_numbers = #tpu.dot_dimension_numbers<[0], [2], [2], [1], [0, 1, 0, 2, 1, 1], [1], [0]>} : vector<16x4x8xf32>, vector<4x8x16xf32>, vector<4x8x8xf32> -> vector<4x8x8xf32>
    %59 = tpu.transpose %58, [2, 0, 1] : vector<4x8x8xf32> -> vector<8x4x8xf32>
    "tpu.trace_stop"() : () -> ()
    %60 = vector.shape_cast %59 : vector<8x4x8xf32> to vector<8x32xf32>
    %c0_31 = arith.constant 0 : index
    %c0_32 = arith.constant 0 : index
    %61 = vector.load %arg10[%c0_31, %c0_32] : memref<32x32xf32, #tpu.memory_space<vmem>>, vector<32x32xf32>
    %cst_33 = arith.constant dense<0.000000e+00> : vector<8x32xf32>
    %62 = tpu.matmul %60, %61, %cst_33 {dimension_numbers = #tpu.dot_dimension_numbers<[1], [0], [0], [1], [0, 0, 1, 1], [], []>} : vector<8x32xf32>, vector<32x32xf32>, vector<8x32xf32> -> vector<8x32xf32>
    %c0_34 = arith.constant 0 : index
    %c0_35 = arith.constant 0 : index
    %63 = vector.load %arg11[%c0_34, %c0_35] : memref<1x32xf32, #tpu.memory_space<vmem>>, vector<1x32xf32>
    %64 = vector.broadcast %63 : vector<1x32xf32> to vector<8x32xf32>
    %65 = arith.addf %62, %64 : vector<8x32xf32>
    %66 = arith.addf %1, %65 : vector<8x32xf32>
    %c0_36 = arith.constant 0 : index
    %c0_37 = arith.constant 0 : index
    %c0_38 = arith.constant 0 : index
    %67 = vector.load %arg12[%c0_36, %c0_37, %c0_38] : memref<1x8x32xf32, #tpu.memory_space<vmem>>, vector<1x8x32xf32>
    %68 = vector.shape_cast %67 : vector<1x8x32xf32> to vector<8x32xf32>
    %69 = vector.shape_cast %66 : vector<8x32xf32> to vector<1x8x32xf32>
    tpu.vector_store %arg12[%c0_36, %c0_37, %c0_38], %69 {strides = array<i32>} : memref<1x8x32xf32, #tpu.memory_space<vmem>>, vector<1x8x32xf32>,
    return
  }
  func.func @transform_0(%arg0: i32) -> (i32, i32, i32) {
    %c0_i32 = arith.constant 0 : i32
    %c0_i32_0 = arith.constant 0 : i32
    %c0_i32_1 = arith.constant 0 : i32
    return %arg0, %c0_i32, %c0_i32_0 : i32, i32, i32
  }
  func.func @transform_1(%arg0: i32) -> (i32, i32, i32) {
    %c0_i32 = arith.constant 0 : i32
    %c0_i32_0 = arith.constant 0 : i32
    %c0_i32_1 = arith.constant 0 : i32
    return %arg0, %c0_i32, %c0_i32_0 : i32, i32, i32
  }
  func.func @transform_2(%arg0: i32) -> (i32, i32, i32) {
    %c0_i32 = arith.constant 0 : i32
    %c0_i32_0 = arith.constant 0 : i32
    %c0_i32_1 = arith.constant 0 : i32
    return %arg0, %c0_i32, %c0_i32_0 : i32, i32, i32
  }
  func.func @transform_3(%arg0: i32) -> (i32, i32) {
    %c0_i32 = arith.constant 0 : i32
    %c0_i32_0 = arith.constant 0 : i32
    %c0_i32_1 = arith.constant 0 : i32
    return %c0_i32, %c0_i32_0 : i32, i32
  }
  func.func @transform_4(%arg0: i32) -> (i32, i32) {
    %c0_i32 = arith.constant 0 : i32
    %c0_i32_0 = arith.constant 0 : i32
    %c0_i32_1 = arith.constant 0 : i32
    return %c0_i32, %c0_i32_0 : i32, i32
  }
  func.func @transform_5(%arg0: i32) -> (i32, i32) {
    %c0_i32 = arith.constant 0 : i32
    %c0_i32_0 = arith.constant 0 : i32
    %c0_i32_1 = arith.constant 0 : i32
    return %c0_i32, %c0_i32_0 : i32, i32
  }
  func.func @transform_6(%arg0: i32) -> (i32, i32) {
    %c0_i32 = arith.constant 0 : i32
    %c0_i32_0 = arith.constant 0 : i32
    %c0_i32_1 = arith.constant 0 : i32
    return %c0_i32, %c0_i32_0 : i32, i32
  }
  func.func @transform_7(%arg0: i32) -> (i32, i32) {
    %c0_i32 = arith.constant 0 : i32
    %c0_i32_0 = arith.constant 0 : i32
    %c0_i32_1 = arith.constant 0 : i32
    return %c0_i32, %c0_i32_0 : i32, i32
  }
  func.func @transform_8(%arg0: i32) -> (i32, i32) {
    %c0_i32 = arith.constant 0 : i32
    %c0_i32_0 = arith.constant 0 : i32
    %c0_i32_1 = arith.constant 0 : i32
    return %c0_i32, %c0_i32_0 : i32, i32
  }
  func.func @transform_9(%arg0: i32) -> (i32, i32) {
    %c0_i32 = arith.constant 0 : i32
    %c0_i32_0 = arith.constant 0 : i32
    %c0_i32_1 = arith.constant 0 : i32
    return %c0_i32, %c0_i32_0 : i32, i32
  }
  func.func @transform_10(%arg0: i32) -> (i32, i32) {
    %c0_i32 = arith.constant 0 : i32
    %c0_i32_0 = arith.constant 0 : i32
    %c0_i32_1 = arith.constant 0 : i32
    return %c0_i32, %c0_i32_0 : i32, i32
  }
  func.func @transform_11(%arg0: i32) -> (i32, i32, i32) {
    %c0_i32 = arith.constant 0 : i32
    %c0_i32_0 = arith.constant 0 : i32
    %c0_i32_1 = arith.constant 0 : i32
    return %arg0, %c0_i32, %c0_i32_0 : i32, i32, i32
  }
}

module attributes {stable_mosaic.version = 11 : i64} {
  func.func @_ffn_sublayer_kernel(%arg0: i32, %arg1: memref<1x8x32xf32, #tpu.memory_space<vmem>>, %arg2: memref<1x32xf32, #tpu.memory_space<vmem>>, %arg3: memref<1x32xf32, #tpu.memory_space<vmem>>, %arg4: memref<32x64xf32, #tpu.memory_space<vmem>>, %arg5: memref<1x64xf32, #tpu.memory_space<vmem>>, %arg6: memref<64x32xf32, #tpu.memory_space<vmem>>, %arg7: memref<1x32xf32, #tpu.memory_space<vmem>>, %arg8: memref<1x8x32xf32, #tpu.memory_space<vmem>>) attributes {dimension_semantics = [#tpu.dimension_semantics<parallel>], iteration_bounds = array<i64: 2>, scalar_prefetch = 0 : i64, scratch_operands = 0 : i64, tpu.core_type = #tpu.core_type<tc>, window_params = [{transform_indices = @transform_0, window_bounds = array<i64: 1, 8, 32>}, {pipeline_mode = #tpu.pipeline_mode<synchronous>, transform_indices = @transform_1, window_bounds = array<i64: 1, 32>}, {pipeline_mode = #tpu.pipeline_mode<synchronous>, transform_indices = @transform_2, window_bounds = array<i64: 1, 32>}, {pipeline_mode = #tpu.pipeline_mode<synchronous>, transform_indices = @transform_3, window_bounds = array<i64: 32, 64>}, {pipeline_mode = #tpu.pipeline_mode<synchronous>, transform_indices = @transform_4, window_bounds = array<i64: 1, 64>}, {pipeline_mode = #tpu.pipeline_mode<synchronous>, transform_indices = @transform_5, window_bounds = array<i64: 64, 32>}, {pipeline_mode = #tpu.pipeline_mode<synchronous>, transform_indices = @transform_6, window_bounds = array<i64: 1, 32>}, {transform_indices = @transform_7, window_bounds = array<i64: 1, 8, 32>}]} {
    %c0 = arith.constant 0 : index
    %c0_0 = arith.constant 0 : index
    %c0_1 = arith.constant 0 : index
    %0 = vector.load %arg1[%c0, %c0_0, %c0_1] : memref<1x8x32xf32, #tpu.memory_space<vmem>>, vector<1x8x32xf32>
    %1 = vector.shape_cast %0 : vector<1x8x32xf32> to vector<8x32xf32>
    %c0_2 = arith.constant 0 : index
    %c0_3 = arith.constant 0 : index
    %2 = vector.load %arg2[%c0_2, %c0_3] : memref<1x32xf32, #tpu.memory_space<vmem>>, vector<1x32xf32>
    %c0_4 = arith.constant 0 : index
    %c0_5 = arith.constant 0 : index
    %3 = vector.load %arg3[%c0_4, %c0_5] : memref<1x32xf32, #tpu.memory_space<vmem>>, vector<1x32xf32>
    %cst = arith.constant dense<0.000000e+00> : vector<8xf32>
    %4 = vector.multi_reduction <add>, %1, %cst [1] : vector<8x32xf32> to vector<8xf32>
    %5 = vector.shape_cast %4 : vector<8xf32> to vector<8x1xf32>
    %cst_6 = arith.constant 3.200000e+01 : f32
    %6 = vector.broadcast %cst_6 : f32 to vector<8x1xf32>
    %7 = arith.divf %5, %6 : vector<8x1xf32>
    %8 = vector.broadcast %7 : vector<8x1xf32> to vector<8x32xf32>
    %9 = arith.subf %1, %8 : vector<8x32xf32>
    %10 = arith.mulf %9, %9 : vector<8x32xf32>
    %cst_7 = arith.constant dense<0.000000e+00> : vector<8xf32>
    %11 = vector.multi_reduction <add>, %10, %cst_7 [1] : vector<8x32xf32> to vector<8xf32>
    %12 = vector.shape_cast %11 : vector<8xf32> to vector<8x1xf32>
    %cst_8 = arith.constant 3.100000e+01 : f32
    %13 = vector.broadcast %cst_8 : f32 to vector<8x1xf32>
    %14 = arith.divf %12, %13 : vector<8x1xf32>
    %15 = math.sqrt %14 : vector<8x1xf32>
    %16 = vector.broadcast %2 : vector<1x32xf32> to vector<8x32xf32>
    %17 = arith.mulf %16, %9 : vector<8x32xf32>
    %cst_9 = arith.constant 9.99999997E-7 : f32
    %18 = vector.broadcast %cst_9 : f32 to vector<8x1xf32>
    %19 = arith.addf %15, %18 : vector<8x1xf32>
    %20 = vector.broadcast %19 : vector<8x1xf32> to vector<8x32xf32>
    %21 = arith.divf %17, %20 : vector<8x32xf32>
    %22 = vector.broadcast %3 : vector<1x32xf32> to vector<8x32xf32>
    %23 = arith.addf %21, %22 : vector<8x32xf32>
    %c0_10 = arith.constant 0 : index
    %c0_11 = arith.constant 0 : index
    %24 = vector.load %arg4[%c0_10, %c0_11] : memref<32x64xf32, #tpu.memory_space<vmem>>, vector<32x64xf32>
    %cst_12 = arith.constant dense<0.000000e+00> : vector<8x64xf32>
    %25 = tpu.matmul %23, %24, %cst_12 {dimension_numbers = #tpu.dot_dimension_numbers<[1], [0], [0], [1], [0, 0, 1, 1], [], []>} : vector<8x32xf32>, vector<32x64xf32>, vector<8x64xf32> -> vector<8x64xf32>
    %c0_13 = arith.constant 0 : index
    %c0_14 = arith.constant 0 : index
    %26 = vector.load %arg5[%c0_13, %c0_14] : memref<1x64xf32, #tpu.memory_space<vmem>>, vector<1x64xf32>
    %27 = vector.broadcast %26 : vector<1x64xf32> to vector<8x64xf32>
    %28 = arith.addf %25, %27 : vector<8x64xf32>
    %cst_15 = arith.constant 0.000000e+00 : f32
    %29 = vector.broadcast %cst_15 : f32 to vector<8x64xf32>
    %30 = arith.maximumf %28, %29 : vector<8x64xf32>
    %c0_16 = arith.constant 0 : index
    %c0_17 = arith.constant 0 : index
    %31 = vector.load %arg6[%c0_16, %c0_17] : memref<64x32xf32, #tpu.memory_space<vmem>>, vector<64x32xf32>
    %cst_18 = arith.constant dense<0.000000e+00> : vector<8x32xf32>
    %32 = tpu.matmul %30, %31, %cst_18 {dimension_numbers = #tpu.dot_dimension_numbers<[1], [0], [0], [1], [0, 0, 1, 1], [], []>} : vector<8x64xf32>, vector<64x32xf32>, vector<8x32xf32> -> vector<8x32xf32>
    %c0_19 = arith.constant 0 : index
    %c0_20 = arith.constant 0 : index
    %33 = vector.load %arg7[%c0_19, %c0_20] : memref<1x32xf32, #tpu.memory_space<vmem>>, vector<1x32xf32>
    %34 = vector.broadcast %33 : vector<1x32xf32> to vector<8x32xf32>
    %35 = arith.addf %32, %34 : vector<8x32xf32>
    %36 = arith.addf %1, %35 : vector<8x32xf32>
    %c0_21 = arith.constant 0 : index
    %c0_22 = arith.constant 0 : index
    %c0_23 = arith.constant 0 : index
    %37 = vector.load %arg8[%c0_21, %c0_22, %c0_23] : memref<1x8x32xf32, #tpu.memory_space<vmem>>, vector<1x8x32xf32>
    %38 = vector.shape_cast %37 : vector<1x8x32xf32> to vector<8x32xf32>
    %39 = vector.shape_cast %36 : vector<8x32xf32> to vector<1x8x32xf32>
    tpu.vector_store %arg8[%c0_21, %c0_22, %c0_23], %39 {strides = array<i32>} : memref<1x8x32xf32, #tpu.memory_space<vmem>>, vector<1x8x32xf32>,
    return
  }
  func.func @transform_0(%arg0: i32) -> (i32, i32, i32) {
    %c0_i32 = arith.constant 0 : i32
    %c0_i32_0 = arith.constant 0 : i32
    %c0_i32_1 = arith.constant 0 : i32
    return %arg0, %c0_i32, %c0_i32_0 : i32, i32, i32
  }
  func.func @transform_1(%arg0: i32) -> (i32, i32) {
    %c0_i32 = arith.constant 0 : i32
    %c0_i32_0 = arith.constant 0 : i32
    %c0_i32_1 = arith.constant 0 : i32
    return %c0_i32, %c0_i32_0 : i32, i32
  }
  func.func @transform_2(%arg0: i32) -> (i32, i32) {
    %c0_i32 = arith.constant 0 : i32
    %c0_i32_0 = arith.constant 0 : i32
    %c0_i32_1 = arith.constant 0 : i32
    return %c0_i32, %c0_i32_0 : i32, i32
  }
  func.func @transform_3(%arg0: i32) -> (i32, i32) {
    %c0_i32 = arith.constant 0 : i32
    %c0_i32_0 = arith.constant 0 : i32
    %c0_i32_1 = arith.constant 0 : i32
    return %c0_i32, %c0_i32_0 : i32, i32
  }
  func.func @transform_4(%arg0: i32) -> (i32, i32) {
    %c0_i32 = arith.constant 0 : i32
    %c0_i32_0 = arith.constant 0 : i32
    %c0_i32_1 = arith.constant 0 : i32
    return %c0_i32, %c0_i32_0 : i32, i32
  }
  func.func @transform_5(%arg0: i32) -> (i32, i32) {
    %c0_i32 = arith.constant 0 : i32
    %c0_i32_0 = arith.constant 0 : i32
    %c0_i32_1 = arith.constant 0 : i32
    return %c0_i32, %c0_i32_0 : i32, i32
  }
  func.func @transform_6(%arg0: i32) -> (i32, i32) {
    %c0_i32 = arith.constant 0 : i32
    %c0_i32_0 = arith.constant 0 : i32
    %c0_i32_1 = arith.constant 0 : i32
    return %c0_i32, %c0_i32_0 : i32, i32
  }
  func.func @transform_7(%arg0: i32) -> (i32, i32, i32) {
    %c0_i32 = arith.constant 0 : i32
    %c0_i32_0 = arith.constant 0 : i32
    %c0_i32_1 = arith.constant 0 : i32
    return %arg0, %c0_i32, %c0_i32_0 : i32, i32, i32
  }
}

</mosaic_0001>

<bundles_post_ra>
// kernel: decoder_layer_forward.5
= control target key start
LH: loop header
LB: loop body
LE: loop exit
PB: predicated region body
PF: predicated region fallthrough
CT: control target
= control target key end

     0   :  { %12 = vsyncpa [#allocation3], 0  ;;  %s952_s0 = inlined_call_operand.vmem [shape: f32[2,8,32], index: 0, kind: input, shape index: {}]   ;;  %s953_s1 = inlined_call_operand.vmem [shape: f32[1,32], index: 1, kind: input, shape index: {}]   ;;  %s954_s2 = inlined_call_operand.vmem [shape: f32[1,32], index: 2, kind: input, shape index: {}]   ;;  %s955_s3 = inlined_call_operand.vmem [shape: f32[32,64], index: 3, kind: input, shape index: {}]   ;;  %s956_s4 = inlined_call_operand.vmem [shape: f32[1,64], index: 4, kind: input, shape index: {}]   ;;  %s957_s5 = inlined_call_operand.vmem [shape: f32[64,32], index: 5, kind: input, shape index: {}]   ;;  %s958_s6 = inlined_call_operand.vmem [shape: f32[1,32], index: 6, kind: input, shape index: {}]   ;;  %s959_s7 = inlined_call_operand.hbm [shape: f32[2,8,32], index: 7, kind: output, shape index: {}]  }
   0x1   :  { %14 = vsyncpa [#allocation3 + $0x1], 0  ;;  %s795_s24 = smov 0   ;;  %s797_s25 = smov 0  }
   0x2   :  { %s799_s26 = smov 0   ;;  %s801_s27 = smov 0  }
   0x3 LB: > { %s816_s28 = sadd.s32 4294967295, %s749_s27   ;;  %s563_s29 = sadd.s32 4294967294, %s749_s27   ;;  %s749_s27 = sphi %s801_s27, %s965_s27   ;;  %s745_s26 = sphi %s799_s26, %s964_s26   ;;  %s741_s25 = sphi %s797_s25, %s963_s25   ;;  %s737_s24 = sphi %s795_s24, %s962_s24  }
   0x4   : > { %s820_s30 = sadd.s32 1, %s749_s27   ;;  %s179_s8 = sadd.s32 1, %s745_s26 }
   0x5   : > { %s176_s9 = ssub.s32 %s749_s27, %s820_s30  ;;  %p189_p0 = scmp.ne.s32.totalorder %s745_s26, %s741_s25 }
   0x6   : > { %p177_p1 = scmp.eq.s32.totalorder %s176_s9, 0  ;;  %p190_p2 = scmp.eq.s32.totalorder %s816_s28, 1 }
   0x7   : > { %p195_p3 = scmp.ne.s32.totalorder %s741_s25, %s737_s24  ;;  %p196_p4 = scmp.eq.s32.totalorder %s563_s29, 1 }
   0x8   : > { %s831_s10 = scalar_select %p177_p1, %s745_s26, %s179_s8  }
   0x9   : > { %p833_p5 = por %p190_p2, %p189_p0  ;;  %p837_p6 = por %p196_p4, %p195_p3 }
   0xa   : > { %p566_p7 = scmp.ge.s32.totalorder %s749_s27, 1  ;;  %p239_p8 = scmp.lt.s32.totalorder %s749_s27, 3 }
   0xc   : > { %p240_p9 = pnand %p566_p7, %p239_p8 }
   0xd   : > { %p270_p10 = scmp.lt.s32.totalorder (!%p240_p9), %s816_s28, 1  ;;  %vm277_vm0 = vcmask (!%p240_p9), 261120   ;;  %v314_v7 = vld [vmem:[%s955_s3] sm:$0xff] (!%p240_p9)  ;;  %v315_v8 = vld [vmem:[%s955_s3 + $0x8] sm:$0xff] (!%p240_p9)  ;;  %v316_v9 = vld [vmem:[%s955_s3 + $0x10] sm:$0xff] (!%p240_p9)  ;;  %v751_v10 = vmov (!%p240_p9), 0.0|0.0  }
   0xe   : > { %243 = sbr.rel (%p240_p9) target bundleno = 798 (0x31e), region = 48  ;;  %623 = vmatprep.subr.bf16.mxu0 (!%p240_p9), %v751_v10  ;;  %v624_v11 = vpack.c.bf16 (!%p240_p9), %v315_v8, %v314_v7  ;;  %v317_v12 = vld [vmem:[%s955_s3 + $0x18] sm:$0xff] (!%p240_p9)  ;;  %vm752_vm1 = vmmov (!%p240_p9), 0   ;;  %v753_v13 = vmov (!%p240_p9), 0.0   ;;  %629 = vmatprep.subr.bf16.mxu1 (!%p240_p9), %v751_v10  ;;  %v399_v15 = vld [vmem:[%s957_s5] sm:$0xff] (!%p240_p9)  ;;  %v400_v16 = vld [vmem:[%s957_s5 + $0x8] sm:$0xff] (!%p240_p9) }
   0xf   : > { %601 = vmatprep.mubr.msk.f32.mxu0 (!%p240_p9), %vm752_vm1, %v753_v13  ;;  %620 = vmatprep.mubr.msk.f32.mxu1 (!%p240_p9), %vm752_vm1, %v753_v13  ;;  %v627_v14 = vpack.c.bf16 (!%p240_p9), %v317_v12, %v316_v9  ;;  %v401_v17 = vld [vmem:[%s957_s5 + $0x10] sm:$0xff] (!%p240_p9)  ;;  %v630_v18 = vpack.c.bf16 (!%p240_p9), %v400_v16, %v399_v15  ;;  %v402_v19 = vld [vmem:[%s957_s5 + $0x18] sm:$0xff] (!%p240_p9)  ;;  %v403_v21 = vld [vmem:[%s957_s5 + $0x20] sm:$0xff] (!%p240_p9)  ;;  %vm414_vm4 = vcmask (!%p240_p9), 523264   ;;  %s267_s20 = sand.u32 (!%p240_p9), 1, %s741_s25   ;;  %s576_s29 = sshll.u32 (!%p240_p9), %s816_s28, 7 }
  0x10   : > { %625 = vmatpush3.bf16.msra.mxu0 (!%p240_p9), %v624_v11  ;;  %v633_v20 = vpack.c.bf16 (!%p240_p9), %v402_v19, %v401_v17  ;;  %v404_v22 = vld [vmem:[%s957_s5 + $0x28] sm:$0xff] (!%p240_p9)  ;;  %v569_v32 = vld [vmem:[%s953_s1] ss:$0 sm:$0xff] (!%p240_p9)  ;;  %v405_v38 = vld [vmem:[%s957_s5 + $0x30] sm:$0xff] (!%p240_p9)  ;;  %s567_s21 = sshll.u32 (!%p240_p9), %s267_s20, 3  ;;  %s909_s15 = scalar_lea.hbm (!%p240_p9), %s959_s7, %s576_s29 }
  0x11   : > { %626 = vmatprep.subr.bf16.mxu0 (!%p240_p9), %v751_v10  ;;  %631 = vmatpush3.bf16.msra.mxu1 (!%p240_p9), %v630_v18  ;;  %v636_v23 = vpack.c.bf16 (!%p240_p9), %v404_v22, %v403_v21  ;;  %v570_v35 = vld [vmem:[%s954_s2] ss:$0 sm:$0xff] (!%p240_p9)  ;;  %v406_v39 = vld [vmem:[%s957_s5 + $0x38] sm:$0xff] (!%p240_p9)  ;;  %s269_s8 = scalar_lea.vmem (!%p240_p9), [#allocation2], %s567_s21  ;;  %s491_s16 = scalar_lea.sflag (!%p240_p9), [#allocation3], %s267_s20 }
  0x12   : > { %632 = vmatprep.subr.bf16.mxu1 (!%p240_p9), %v751_v10  ;;  %v639_v40 = vpack.c.bf16 (!%p240_p9), %v406_v39, %v405_v38  ;;  %v571_v41 = vld [vmem:[%s956_s4] ss:$0 sm:$0xff] (!%p240_p9)  ;;  %s504_s9 = sshll.u32 (!%p240_p9), %s269_s8, 4  ;;  %s911_s9 = int_to_ptr.vmem [resolvable:$true] %s504_s9 }
  0x13   : > { %v573_v46 = vld [vmem:[%s958_s6] ss:$0 sm:$0xff] (!%p240_p9) }
  0x14   : > { %628 = vmatpush3.bf16.msra.mxu0 (!%p240_p9), %v627_v14 }
  0x15   : > { %s271_s13 = scalar_select %p270_p10, %s816_s28, 1  ;;  %634 = vmatpush3.bf16.msra.mxu1 %v633_v20 }
  0x16   : > { %635 = vmatprep.subr.bf16.mxu1 %v751_v10  ;;  %s687_s28 = scalar_lea.vmem %s911_s9, 128 }
  0x17   : > { %s568_s14 = sshll.u32 %s271_s13, 3  ;;  %p688_p11 = scmp.ne.s32.totalorder %s911_s9, %s687_s28 }
  0x18   : > { %s273_s17 = scalar_lea.vmem %s952_s0, %s568_s14 }
  0x19   : > { %v848_v0 = vld [vmem:[%s273_s17] sm:$0xff]  ;;  %637 = vmatpush3.bf16.msra.mxu1 %v636_v23  ;;  %p689_p12 = pnand %p688_p11, %p833_p5  ;;  %s754_s17 = smov [#allocation2]  }
  0x1a   : > { %v278_v1 = vsel %vm277_vm0, %v848_v0, 0.0  ;;  %638 = vmatprep.subr.bf16.mxu1 %v751_v10  ;;  %s691_s18 = sshll.u32 %s754_s17, 4  ;;  %s692_s18 = int_to_ptr.vmem [resolvable:$false] %s691_s18 }
  0x1b   : > { %279 = vadd.xlane.f32.xlu0 %v278_v1  ;;  %p690_p13 = pneg %p689_p12  ;;  %s693_s19 = scalar_lea.vmem %s692_s18, 256 }
  0x1c   : > { %p694_p0 = scmp.lt.s32.totalorder %s911_s9, %s692_s18  ;;  %p695_p1 = scmp.lt.s32.totalorder %s693_s19, %s687_s28 }
  0x1d   : > { %640 = vmatpush3.bf16.msra.mxu1 %v639_v40 }
  0x1e   : > { %p696_p2 = por %p695_p1, %p694_p0 }
  0x20   : > { %p697_p3 = pnand %p696_p2, %p690_p13 }
  0xa8   : > { %v280_v2 = vpop.xlane.xlu0 %279 }
  0xa9   : > { %v282_v3 = vmul.f32 0.03125, %v280_v2 }
  0xab   : > { %v283_v4 = vsub.f32 %v848_v0, %v282_v3 }
  0xad   : > { %v284_v5 = vmul.f32 %v283_v4, %v283_v4  ;;  %v303_v33 = vmul.f32 %v569_v32, %v283_v4 }
  0xaf   : > { %v285_v6 = vsel %vm277_vm0, %v284_v5, 0.0 }
  0xb0   : > { %286 = vadd.xlane.f32.xlu0 %v285_v6 }
 0x13d   : > { %v287_v24 = vpop.xlane.xlu0 %286 }
 0x13e   : > { %v289_v25 = vmul.f32 0.032258064, %v287_v24 }
 0x140   : > { %683 = vrsqrt.f32 %v289_v25  ;;  %vm292_vm2 = vcmp.eq.f32.partialorder %v289_v25, inf  ;;  %v295_v28 = vand.u32 2147483648, %v289_v25  ;;  %vm294_vm3 = vcmp.eq.f32.partialorder %v289_v25, 0.0 }
 0x14a   : > { %v684_v26 = vpop.eup %683 }
 0x14b   : > { %v291_v27 = vmul.f32 %v684_v26, %v289_v25 }
 0x14d   : > { %v293_v29 = vsel %vm292_vm2, %v289_v25, %v291_v27 }
 0x14e   : > { %v296_v30 = vsel %vm294_vm3, %v295_v28, %v293_v29 }
 0x14f   : > { %v304_v31 = vadd.f32 1e-06, %v296_v30 }
 0x151   : > { %685 = vrcp.f32 %v304_v31 }
 0x15b   : > { %v686_v34 = vpop.eup %685 }
 0x15c   : > { %v306_v36 = vmul.f32 %v686_v34, %v303_v33 }
 0x15e   : > { %v313_v37 = vadd.f32 %v570_v35, %v306_v36 }
 0x160   : > { %602 = vmatmul.mubr.msk.f32.vlgmr.msra.gmra.mrb[0].mxu0 %vm277_vm0, %v313_v37 }
 0x233   : > { %v394_v42 = vpop.f32.mrb[0].mxu0 }
 0x234   : > { %v395_v43 = vadd.f32 %v571_v41, %v394_v42  ;;  %v603_v44 = vpop.f32.mrb[1].mxu0 }
 0x236   : > { %v398_v45 = vmax.f32 %v395_v43, 0.0 }
 0x238   : > { %621 = vmatmul.mubr.msk.f32.vlgmr.msra.gmra.mrb[0].mxu1 %vm414_vm4, %v398_v45 }
 0x30b   : > { %v484_v47 = vpop.f32.mrb[0].mxu1 }
 0x30c   : > { %v485_v48 = vadd.f32 %v573_v46, %v484_v47  ;;  %v622_v49 = vpop.f32.mrb[1].mxu1 }
 0x30e   : > { %v488_v50 = vadd.f32 %v485_v48, %v848_v0 }
 0x310   : > { %489 = vst.msk [vmem:[%s269_s8] sm:$0xff] %vm277_vm0, %v488_v50 }
 0x311   : > { %700 = shalt.err (!%p697_p3)
}
 0x312   : > { %s701_s20 = scalar_lea.hbm %s909_s15, 128  ;;  %s705_s23 = scalar_lea.hbm %s959_s7, 256 }
 0x313   : > { %p702_p4 = scmp.ne.s32.totalorder %s909_s15, %s701_s20  ;;  %p706_p9 = scmp.lt.u32.totalorder %s909_s15, %s959_s7 }
 0x314   : > { %p707_p10 = scmp.lt.u32.totalorder %s705_s23, %s701_s20  ;;  %p709_p12 = scmp.lt.u32.totalorder %s701_s20, %s909_s15 }
 0x315   : > { %p703_p7 = pnand %p702_p4, %p833_p5 }
 0x316   : > { %p708_p11 = por %p707_p10, %p706_p9 }
 0x317   : > { %p704_p8 = pneg %p703_p7 }
 0x318   : > { %p710_p13 = por %p709_p12, %p708_p11 }
 0x31a   : > { %p711_p0 = pnand %p710_p13, %p704_p8 }
 0x31c   : > { %714 = shalt.err (!%p711_p0)
}
 0x31d   : > { %641 = dma.vmem_to_hbm [thread:$0]  (%p833_p5), %s911_s9, 128, %s909_s15, %s491_s16  }
 0x31e PF: > { %p647_p1 = scmp.ge.s32.totalorder %s749_s27, 2  ;;  %s516_s13 = sand.u32 1, %s737_s24  }
 0x31f   : > { %s517_s14 = scalar_lea.sflag [#allocation3], %s516_s13 }
 0x320   : > { %p644_p2 = pnand %p647_p1, %p837_p6 }
 0x322   : > { %732 = dma.done.wait (!%p644_p2), %s517_s14, 128  }
 0x323   : > { %734 = vsyncadd (!%p644_p2), %s517_s14, 4294967168  ;;  %p17_p3 = scmp.ge.s32.totalorder %s820_s30, 4   ;;  %s962_s24 = smov %s741_s25 }
 0x324   : > { %s963_s25 = smov %s745_s26  ;;  %s964_s26 = smov %s831_s10 }
 0x325   : > { %s965_s27 = smov %s820_s30  ;;  %19 = sbr.rel (!%p17_p3) target bundleno = 3 (0x3), region = 83 }
 0x32c   :  { %522 = vsyncpa [#allocation3], 1 }
 0x32d   :  { %524 = vsyncpa [#allocation3 + $0x1], 1 }

// kernel: decoder_layer_forward.3
= control target key start
LH: loop header
LB: loop body
LE: loop exit
PB: predicated region body
PF: predicated region fallthrough
CT: control target
= control target key end

     0   :  { %13 = vsyncpa [#allocation3], 0  ;;  %s2115_s27 = smov 0   ;;  %s2283_s0 = inlined_call_operand.vmem [shape: f32[2,8,32], index: 0, kind: input, shape index: {}]   ;;  %s2284_s1 = inlined_call_operand.vmem [shape: f32[2,8,8], index: 1, kind: input, shape index: {}]   ;;  %s2285_s2 = inlined_call_operand.vmem [shape: f32[1,32], index: 2, kind: input, shape index: {}]   ;;  %s2286_s3 = inlined_call_operand.hbm [shape: f32[1,32], index: 3, kind: input, shape index: {}]   ;;  %s2287_s4 = inlined_call_operand.vmem [shape: f32[32,96], index: 4, kind: input, shape index: {}]   ;;  %s2288_s5 = inlined_call_operand.vmem [shape: f32[1,96], index: 5, kind: input, shape index: {}]   ;;  %s2289_s6 = inlined_call_operand.vmem [shape: f32[32,32], index: 6, kind: input, shape index: {}]   ;;  %s2290_s7 = inlined_call_operand.vmem [shape: f32[1,32], index: 7, kind: input, shape index: {}]   ;;  %s2291_s8 = inlined_call_operand.vmem [shape: f32[2,8,32], index: 8, kind: output, shape index: {}]  }
   0x1 LB: > { %s2121_s28 = sadd.s32 4294967295, %s2054_s27   ;;  %p1834_p0 = scmp.ge.s32.totalorder %s2054_s27, 1  ;;  %s2054_s27 = sphi %s2115_s27, %s19_s27  }
   0x2   : > { %p228_p1 = scmp.lt.s32.totalorder %s2054_s27, 3  ;;  %p2292_p3 = scmp.eq.s32.totalorder %s2121_s28, 0 }
   0x3   : > { %s2056_s30 = smov [#allocation2]   ;;  %s2016_s13 = scalar_lea.hbm %s2286_s3, 16 }
   0x4   : > { %p2125_p2 = pnand %p1834_p0, %p228_p1  ;;  %s244_s9 = sshll.u32 %s2056_s30, 4  ;;  %s245_s9 = int_to_ptr.vmem [resolvable:$true] %s244_s9 }
   0x5   : > { %p2017_p6 = scmp.ne.s32.totalorder %s2286_s3, %s2016_s13  ;;  %p2023_p10 = scmp.lt.u32.totalorder %s2016_s13, %s2286_s3 }
   0x6   : > { %s2294_s29 = scalar_select %p2125_p2, 1, 0 }
   0x7   : > { %p1968_p4 = pneg %p2125_p2 }
   0x9   : > { %p2134_p5 = pnand %p2292_p3, %p1968_p4 }
   0xb   : > { %p2018_p7 = pneg %p2134_p5 }
   0xd   : > { %p2019_p8 = pnand %p2018_p7, %p2017_p6 }
   0xf   : > { %p2020_p9 = pneg %p2019_p8 }
  0x11   : > { %p2025_p11 = pnand %p2023_p10, %p2020_p9 }
  0x13   : > { %2028 = shalt.err (!%p2025_p11)
}
  0x14   : > { %s2029_s18 = scalar_lea.vmem %s245_s9, 16  ;;  %s2036_s19 = scalar_lea.vmem %s245_s9, 32 }
  0x15   : > { %p2030_p12 = scmp.ne.s32.totalorder %s245_s9, %s2029_s18  ;;  %p2037_p1 = scmp.lt.s32.totalorder %s245_s9, %s245_s9 }
  0x16   : > { %p2038_p4 = scmp.lt.s32.totalorder %s2036_s19, %s2029_s18 }
  0x17   : > { %p2032_p13 = pnand %p2030_p12, %p2018_p7 }
  0x18   : > { %p2039_p3 = por %p2038_p4, %p2037_p1 }
  0x19   : > { %p2033_p0 = pneg %p2032_p13 }
  0x1b   : > { %p2040_p2 = pnand %p2039_p3, %p2033_p0 }
  0x1d   : > { %2043 = shalt.err (!%p2040_p2)
}
  0x1e   : > { %1971 = dma.hbm_to_vmem [thread:$0]  (!%p2134_p5), %s2286_s3, 16, %s245_s9, [#allocation3]  }
  0x1f   : > { %p2296_p6 = scmp.ne.s32.totalorder %s2294_s29, 0 }
  0x20   : > { %p2297_p8 = scmp.eq.s32.totalorder (!%p2296_p6), %s2121_s28, 0 }
  0x21   : > { %283 = sbr.rel (%p2296_p6) target bundleno = 2212 (0x8a4), region = 52 }
  0x28   : > { %2049 = dma.done.wait (%p2297_p8), [#allocation3], 16   ;;  %p2298_p7 = pmov %p2297_p8 }
  0x29   : > { %p319_p9 = scmp.lt.s32.totalorder %s2121_s28, 1  ;;  %vm334_vm0 = vcmask 261120   ;;  %v371_v7 = vld [vmem:[%s2287_s4] sm:$0xff]  ;;  %v372_v8 = vld [vmem:[%s2287_s4 + $0x8] sm:$0xff]  ;;  %v373_v9 = vld [vmem:[%s2287_s4 + $0x10] sm:$0xff]  ;;  %v2057_v10 = vmov 0.0|0.0  }
  0x2a   : > { %2051 = vsyncadd (%p2298_p7), [#allocation3], 4294967280  ;;  %1952 = vmatprep.subr.bf16.mxu0 %v2057_v10  ;;  %v1953_v11 = vpack.c.bf16 %v372_v8, %v371_v7  ;;  %v374_v12 = vld [vmem:[%s2287_s4 + $0x18] sm:$0xff]  ;;  %vm2058_vm1 = vmmov 0   ;;  %v2059_v13 = vmov 0.0   ;;  %s2060_s17 = smov 104  }
  0x2b   : > { %s2300_s28 = smov (!%p319_p9, %s2121_s28), 1  ;;  %1898 = vmatprep.mubr.msk.f32.mxu0 %vm2058_vm1, %v2059_v13  ;;  %1906 = vmatprep.subr.mxu1 %v2059_v13  ;;  %v1956_v14 = vpack.c.bf16 %v374_v12, %v373_v9  ;;  %v1842_v23 = vld [vmem:[%s2285_s2] ss:$0 sm:$0xff]  ;;  %s2061_s18 = smov 120   ;;  %vm603_vm4 = vcmask 64512   ;;  %vm1665_vm5 = vcmask 130048  }
  0x2c   : > { %s2162_s22 = sshll.u32 %s2300_s28, 3  ;;  %1908 = vmatprep.mubr.msk.f32.mxu1 %vm2058_vm1, %v2059_v13  ;;  %1954 = vmatpush3.bf16.msra.mxu0 %v1953_v11  ;;  %v1843_v26 = vld [vmem:[#allocation2] ss:$0 sm:$0xff]  ;;  %s2062_s19 = smov 112   ;;  %vm1667_vm6 = vcmask 195584  }
  0x2d   : > { %s322_s25 = scalar_lea.vmem %s2283_s0, %s2162_s22  ;;  %1955 = vmatprep.subr.bf16.mxu0 %v2057_v10  ;;  %v1844_v29 = vld [vmem:[%s2288_s5] ss:$0 sm:$0xff]  ;;  %s2063_s20 = smov 96  }
  0x2e   : > { %v2168_v0 = vld [vmem:[%s322_s25] sm:$0xff]  ;;  %s326_s24 = scalar_lea.vmem %s2284_s1, %s2162_s22  ;;  %s2064_s25 = smov 64  }
  0x2f   : > { %v335_v1 = vsel %vm334_vm0, %v2168_v0, 0.0  ;;  %v455_v45 = vld [vmem:[%s326_s24] sm:$0xff]  ;;  %s2067_s13 = smov 16   ;;  %s2068_s14 = smov 8  }
  0x30   : > { %336 = vadd.xlane.f32.xlu0 %v335_v1  ;;  %1957 = vmatpush3.bf16.msra.mxu0 %v1956_v14  ;;  %s2069_s15 = smov 24  }
  0x31   : > { %1901 = vmatprep.subr.mxu0 %v2059_v13 }
  0xbd   : > { %v337_v2 = vpop.xlane.xlu0 %336 }
  0xbe   : > { %v339_v3 = vmul.f32 0.03125, %v337_v2 }
  0xc0   : > { %v340_v4 = vsub.f32 %v2168_v0, %v339_v3 }
  0xc2   : > { %v341_v5 = vmul.f32 %v340_v4, %v340_v4  ;;  %v360_v24 = vmul.f32 %v1842_v23, %v340_v4 }
  0xc4   : > { %v342_v6 = vsel %vm334_vm0, %v341_v5, 0.0 }
  0xc5   : > { %343 = vadd.xlane.f32.xlu0 %v342_v6 }
 0x152   : > { %v344_v15 = vpop.xlane.xlu0 %343 }
 0x153   : > { %v346_v16 = vmul.f32 0.032258064, %v344_v15 }
 0x155   : > { %1996 = vrsqrt.f32 %v346_v16  ;;  %vm349_vm2 = vcmp.eq.f32.partialorder %v346_v16, inf  ;;  %v352_v19 = vand.u32 2147483648, %v346_v16  ;;  %vm351_vm3 = vcmp.eq.f32.partialorder %v346_v16, 0.0 }
 0x15f   : > { %v1997_v17 = vpop.eup %1996 }
 0x160   : > { %v348_v18 = vmul.f32 %v1997_v17, %v346_v16 }
 0x162   : > { %v350_v20 = vsel %vm349_vm2, %v346_v16, %v348_v18 }
 0x163   : > { %v353_v21 = vsel %vm351_vm3, %v352_v19, %v350_v20 }
 0x164   : > { %v361_v22 = vadd.f32 1e-06, %v353_v21 }
 0x166   : > { %1998 = vrcp.f32 %v361_v22 }
 0x170   : > { %v1999_v25 = vpop.eup %1998 }
 0x171   : > { %v363_v27 = vmul.f32 %v1999_v25, %v360_v24 }
 0x173   : > { %v370_v28 = vadd.f32 %v1843_v26, %v363_v27 }
 0x175   : > { %1899 = vmatmul.mubr.msk.f32.vlgmr.msra.gmra.mrb[0].mxu0 %vm334_vm0, %v370_v28 }
 0x176   : > { %1903 = vmatprep.mubr.msk.f32.mxu0 %vm2058_vm1, %v2059_v13 }
 0x248   : > { %v451_v30 = vpop.f32.mrb[0].mxu0 }
 0x249   : > { %v2203_v31 = vadd.f32 %v1844_v29, %v451_v30  ;;  %v1900_v32 = vpop.f32.mrb[1].mxu0 }
 0x24b   : > { %461 = vrot.lane.b32.xlu0 %v2203_v31, %s2060_s17  ;;  %457 = vrot.lane.b32.xlu1 %v2203_v31, %s2061_s18 }
 0x24f   : > { %459 = vrot.lane.b32.xlu1 %v2203_v31, %s2062_s19 }
 0x253   : > { %463 = vrot.lane.b32.xlu1 %v2203_v31, %s2063_s20 }
 0x2bd   : > { %v458_v33 = vpop.permute.xlu1 %457  ;;  %v462_v35 = vpop.permute.xlu0 %461 }
 0x2be   : > { %465 = vrot.lane.b32.xlu1 %v458_v33, %s2063_s20 }
 0x2c1   : > { %v460_v34 = vpop.permute.xlu1 %459 }
 0x2c2   : > { %467 = vrot.lane.b32.xlu1 %v460_v34, %s2063_s20 }
 0x2c5   : > { %v464_v36 = vpop.permute.xlu1 %463 }
 0x2c6   : > { %469 = vrot.lane.b32.xlu1 %v462_v35, %s2063_s20  ;;  %s330_s20 = scalar_lea.vmem %s2291_s8, %s2162_s22 }
 0x2ef   : > { %475 = vxpose.xlu1.b32.start.end [1/1] (short) (narrow) %v464_v36, 8 }
 0x330   : > { %v466_v37 = vpop.permute.xlu1 %465 }
 0x331   : > { %507 = vxpose.xlu0.b32.start.end [1/1] (short) (narrow) %v466_v37, 8 }
 0x334   : > { %v468_v38 = vpop.permute.xlu1 %467 }
 0x335   : > { %539 = vxpose.xlu0.b32.start.end [1/1] (short) (narrow) %v468_v38, 8 }
 0x338   : > { %v470_v39 = vpop.permute.xlu1 %469 }
 0x339   : > { %571 = vxpose.xlu0.b32.start.end [1/1] (short) (narrow) %v470_v39, 8 }
 0x36f   : > { %v491_v40 = vpop.trf.xlu1 }
 0x370   : > { %1902 = vmatpush3.msra.mxu0 %v491_v40 }
 0x371   : > { %1904 = vmatmul.mubr.msk.f32.vlgmr.msra.gmra.mrb[2].mxu0 %vm603_vm4, %v2203_v31  ;;  %1916 = vmatprep.subr.mxu0 %v2059_v13 }
 0x372   : > { %1918 = vmatprep.mubr.msk.f32.mxu0 %vm2058_vm1, %v2059_v13 }
 0x3b1   : > { %v523_v41 = vpop.trf.xlu0 }
 0x3b2   : > { %1907 = vmatpush3.msra.mxu1 %v523_v41 }
 0x3b3   : > { %1909 = vmatmul.mubr.msk.f32.vlgmr.msra.gmra.mrb[0].mxu1 %vm603_vm4, %v458_v33  ;;  %1911 = vmatprep.subr.mxu1 %v2059_v13 }
 0x3b4   : > { %1913 = vmatprep.mubr.msk.f32.mxu1 %vm2058_vm1, %v2059_v13 }
 0x3b5   : > { %v555_v42 = vpop.trf.xlu0 }
 0x3b6   : > { %1912 = vmatpush3.msra.mxu1 %v555_v42 }
 0x3b7   : > { %1914 = vmatmul.mubr.msk.f32.vlgmr.msra.gmra.mrb[2].mxu1 %vm603_vm4, %v460_v34  ;;  %1921 = vmatprep.subr.mxu1 %v2059_v13 }
 0x3b8   : > { %1923 = vmatprep.mubr.msk.f32.mxu1 %vm2058_vm1, %v2059_v13 }
 0x3b9   : > { %v587_v43 = vpop.trf.xlu0 }
 0x3ba   : > { %1917 = vmatpush3.msra.mxu0 %v587_v43 }
 0x3bb   : > { %1919 = vmatmul.mubr.msk.f32.vlgmr.msra.gmra.mrb[4].mxu0 %vm603_vm4, %v462_v35  ;;  %1926 = vmatprep.subr.mxu0 %v2059_v13 }
 0x3bc   : > { %1928 = vmatprep.mubr.msk.f32.mxu0 %vm2058_vm1, %v2059_v13 }
 0x444   : > { %v672_v44 = vpop.f32.mrb[2].mxu0 }
 0x445   : > { %v892_v46 = vmul.f32 0.35355338, %v672_v44  ;;  %v1905_v47 = vpop.f32.mrb[3].mxu0 }
 0x447   : > { %v896_v48 = vadd.f32 %v892_v46, %v455_v45 }
 0x449   : > { %v900_v49 = vsel %vm603_vm4, %v896_v48, -inf }
 0x44a   : > { %901 = vmax.xlane.f32.xlu1 %v900_v49 }
 0x486   : > { %v744_v50 = vpop.f32.mrb[0].mxu1 }
 0x487   : > { %v893_v51 = vmul.f32 0.35355338, %v744_v50  ;;  %v1910_v52 = vpop.f32.mrb[1].mxu1 }
 0x488   : > { %v1669_v52 = vld [vmem:[%s2289_s6] sm:$0xff] }
 0x489   : > { %v897_v53 = vadd.f32 %v893_v51, %v455_v45 }
 0x48a   : > { %v816_v54 = vpop.f32.mrb[2].mxu1 }
 0x48b   : > { %v894_v55 = vmul.f32 0.35355338, %v816_v54  ;;  %v1915_v56 = vpop.f32.mrb[3].mxu1  ;;  %v903_v57 = vsel %vm603_vm4, %v897_v53, -inf }
 0x48c   : > { %904 = vmax.xlane.f32.xlu0 %v903_v57  ;;  %v1521_v57 = vlaneseq }
 0x48d   : > { %v898_v58 = vadd.f32 %v894_v55, %v455_v45  ;;  %v2065_v55 = vmov 1983009808  }
 0x48e   : > { %v888_v59 = vpop.f32.mrb[4].mxu0  ;;  %v1519_v56 = vunpack.c.l.s4 %v2065_v55 }
 0x48f   : > { %v895_v60 = vmul.f32 0.35355338, %v888_v59  ;;  %v1920_v61 = vpop.f32.mrb[5].mxu0  ;;  %v906_v62 = vsel %vm603_vm4, %v898_v58, -inf  ;;  %v2066_v59 = vmov 1934713408  }
 0x490   : > { %907 = vmax.xlane.f32.xlu1 %v906_v62  ;;  %v1520_v61 = vunpack.c.0.s8 %v1519_v56  ;;  %v1522_v62 = vshrl.u32 %v1521_v57, 7 }
 0x491   : > { %v899_v63 = vadd.f32 %v895_v60, %v455_v45  ;;  %v1551_v60 = vunpack.c.l.s4 %v2066_v59 }
 0x493   : > { %v909_v1 = vsel %vm603_vm4, %v899_v63, -inf }
 0x494   : > { %910 = vmax.xlane.f32.xlu1 %v909_v1  ;;  %v1552_v1 = vunpack.c.0.s8 %v1551_v60 }
 0x4a2   : > { %946 = vrot.lane.b32.xlu0 %v458_v33, %s2064_s25 }
 0x4a5   : > { %944 = vrot.lane.b32.xlu1 %v2203_v31, %s2064_s25 }
 0x4a9   : > { %948 = vrot.lane.b32.xlu1 %v460_v34, %s2064_s25 }
 0x4ad   : > { %950 = vrot.lane.b32.xlu1 %v462_v35, %s2064_s25 }
 0x4d7   : > { %v902_v2 = vpop.xlane.xlu1 %901 }
 0x4d8   : > { %v912_v3 = vsub.f32 %v896_v48, %v902_v2  ;;  %v1523_v2 = vsub.s32 %v1520_v61, %v1522_v62 }
 0x4da   : > { %v916_v4 = vmul.f32 1.442695, %v912_v3 }
 0x4dc   : > { %2000 = vpow2.f32 %v916_v4 }
 0x4e6   : > { %v2001_v5 = vpop.eup %2000 }
 0x4e7   : > { %v924_v6 = vsel %vm603_vm4, %v2001_v5, 0.0 }
 0x4e8   : > { %925 = vadd.xlane.f32.xlu0 %v924_v6 }
 0x519   : > { %v905_v7 = vpop.xlane.xlu0 %904 }
 0x51a   : > { %v913_v8 = vsub.f32 %v897_v53, %v905_v7 }
 0x51c   : > { %v918_v9 = vmul.f32 1.442695, %v913_v8  ;;  %v1555_v8 = vsub.s32 %v1552_v1, %v1522_v62 }
 0x51d   : > { %v908_v11 = vpop.xlane.xlu1 %907  ;;  %v947_v25 = vpop.permute.xlu0 %946 }
 0x51e   : > { %2002 = vpow2.f32 %v918_v9  ;;  %v914_v12 = vsub.f32 %v898_v58, %v908_v11 }
 0x520   : > { %v920_v16 = vmul.f32 1.442695, %v914_v12 }
 0x521   : > { %v911_v14 = vpop.xlane.xlu1 %910 }
 0x522   : > { %v915_v15 = vsub.f32 %v899_v63, %v911_v14 }
 0x524   : > { %v922_v17 = vmul.f32 1.442695, %v915_v15 }
 0x525   : > { %v945_v24 = vpop.permute.xlu1 %944 }
 0x526   : > { %2004 = vpow2.f32 %v922_v17 }
 0x527   : > { %2006 = vpow2.f32 %v920_v16 }
 0x528   : > { %v2003_v18 = vpop.eup %2002 }
 0x529   : > { %v927_v19 = vsel %vm603_vm4, %v2003_v18, 0.0  ;;  %v949_v26 = vpop.permute.xlu1 %948 }
 0x52a   : > { %928 = vadd.xlane.f32.xlu1 %v927_v19  ;;  %v1672_v19 = vld [vmem:[%s2289_s6 + $0x18] sm:$0xff] }
 0x52d   : > { %v951_v27 = vpop.permute.xlu1 %950 }
 0x530   : > { %v2005_v20 = vpop.eup %2004 }
 0x531   : > { %v933_v21 = vsel %vm603_vm4, %v2005_v20, 0.0  ;;  %v2007_v22 = vpop.eup %2006 }
 0x532   : > { %934 = vadd.xlane.f32.xlu0 %v933_v21  ;;  %v930_v23 = vsel %vm603_vm4, %v2007_v22, 0.0 }
 0x536   : > { %931 = vadd.xlane.f32.xlu0 %v930_v23 }
 0x55d   : > { %956 = vxpose.xlu1.b32.start.end [1/1] (short) (narrow) %v945_v24, 8 }
 0x563   : > { %988 = vxpose.xlu0.b32.start.end [1/1] (short) (narrow) %v947_v25, 8 }
 0x567   : > { %1020 = vxpose.xlu0.b32.start.end [1/1] (short) (narrow) %v949_v26, 8 }
 0x56b   : > { %1052 = vxpose.xlu0.b32.start.end [1/1] (short) (narrow) %v951_v27, 8 }
 0x575   : > { %v926_v28 = vpop.xlane.xlu0 %925 }
 0x576   : > { %2008 = vrcp.f32 %v926_v28 }
 0x580   : > { %v2009_v29 = vpop.eup %2008 }
 0x581   : > { %v937_v30 = vmul.f32 %v2009_v29, %v2001_v5 }
 0x583   : > { %1922 = vmatpush3.xpose.msk.msra.mxu1 %vm603_vm4, %v937_v30 }
 0x584   : > { %1931 = vmatprep.subr.mxu1 %v2059_v13 }
 0x5b7   : > { %v929_v31 = vpop.xlane.xlu1 %928 }
 0x5b8   : > { %2010 = vrcp.f32 %v929_v31 }
 0x5bf   : > { %v935_v34 = vpop.xlane.xlu0 %934 }
 0x5c2   : > { %v2011_v32 = vpop.eup %2010 }
 0x5c3   : > { %v939_v33 = vmul.f32 %v2011_v32, %v2003_v18  ;;  %v932_v35 = vpop.xlane.xlu0 %931  ;;  %v1671_v18 = vld [vmem:[%s2289_s6 + $0x10] sm:$0xff] }
 0x5c4   : > { %2012 = vrcp.f32 %v932_v35  ;;  %v1962_v24 = vpack.c.bf16 %v1672_v19, %v1671_v18 }
 0x5c5   : > { %1927 = vmatpush3.xpose.msk.msra.mxu0 %vm603_vm4, %v939_v33  ;;  %2014 = vrcp.f32 %v935_v34 }
 0x5c6   : > { %1936 = vmatprep.subr.mxu0 %v2059_v13 }
 0x5ce   : > { %v2013_v36 = vpop.eup %2012 }
 0x5cf   : > { %v941_v37 = vmul.f32 %v2013_v36, %v2007_v22  ;;  %v2015_v39 = vpop.eup %2014 }
 0x5d0   : > { %v943_v40 = vmul.f32 %v2015_v39, %v2005_v20 }
 0x5dd   : > { %v972_v38 = vpop.trf.xlu1 }
 0x5de   : > { %1924 = vmatmul.mubr.msk.f32.vlgmr.msra.gmra.mrb[4].mxu1 %vm603_vm4, %v972_v38 }
 0x5df   : > { %1932 = vmatpush3.xpose.msk.msra.mxu1 %vm603_vm4, %v941_v37  ;;  %1933 = vmatprep.mubr.msk.f32.mxu1 %vm2058_vm1, %v2059_v13 }
 0x5e0   : > { %1958 = vmatprep.subr.bf16.mxu1 %v2057_v10 }
 0x5e3   : > { %v1004_v41 = vpop.trf.xlu0 }
 0x5e4   : > { %1929 = vmatmul.mubr.msk.f32.vlgmr.msra.gmra.mrb[6].mxu0 %vm603_vm4, %v1004_v41 }
 0x5e5   : > { %1937 = vmatpush3.xpose.msk.msra.mxu0 %vm603_vm4, %v943_v40  ;;  %1938 = vmatprep.mubr.msk.f32.mxu0 %vm2058_vm1, %v2059_v13 }
 0x5e7   : > { %v1036_v42 = vpop.trf.xlu0 }
 0x5e8   : > { %1934 = vmatmul.mubr.msk.f32.vlgmr.msra.gmra.mrb[6].mxu1 %vm603_vm4, %v1036_v42 }
 0x5e9   : > { %1949 = vmatprep.mubr.msk.f32.mxu1 %vm2058_vm1, %v2059_v13  ;;  %v1670_v13 = vld [vmem:[%s2289_s6 + $0x8] sm:$0xff] }
 0x5ea   : > { %v1959_v53 = vpack.c.bf16 %v1670_v13, %v1669_v52 }
 0x5eb   : > { %v1068_v43 = vpop.trf.xlu0 }
 0x5ec   : > { %1939 = vmatmul.mubr.msk.f32.vlgmr.msra.gmra.mrb[8].mxu0 %vm603_vm4, %v1068_v43  ;;  %1960 = vmatpush3.bf16.msra.mxu1 %v1959_v53 }
 0x5ed   : > { %1961 = vmatprep.subr.bf16.mxu1 %v2057_v10 }
 0x5f0   : > { %1963 = vmatpush3.bf16.msra.mxu1 %v1962_v24 }
 0x6b1   : > { %v1156_v44 = vpop.f32.mrb[4].mxu1 }
 0x6b2   : > { %1388 = vxpose.xlu1.b32.start.end [1/1] (short) (narrow) %v1156_v44, 8  ;;  %v1925_v45 = vpop.f32.mrb[5].mxu1 }
 0x6b7   : > { %v1232_v46 = vpop.f32.mrb[6].mxu0 }
 0x6b8   : > { %v1930_v47 = vpop.f32.mrb[7].mxu0  ;;  %1420 = vxpose.xlu0.b32.start.end [1/1] (short) (narrow) %v1232_v46, 8 }
 0x6bb   : > { %v1308_v48 = vpop.f32.mrb[6].mxu1 }
 0x6bc   : > { %v1935_v49 = vpop.f32.mrb[7].mxu1  ;;  %1452 = vxpose.xlu1.b32.start.end [1/1] (short) (narrow) %v1308_v48, 8 }
 0x6bf   : > { %v1384_v50 = vpop.f32.mrb[8].mxu0 }
 0x6c0   : > { %1484 = vxpose.xlu0.b32.start.end [1/1] (short) (narrow) %v1384_v50, 8  ;;  %v1940_v51 = vpop.f32.mrb[9].mxu0 }
 0x6c1   : > { %v1860_v51 = vld [vmem:[%s2290_s7] ss:$0 sm:$0xff] }
 0x732   : > { %v1404_v54 = vpop.trf.xlu1 }
 0x738   : > { %v1436_v58 = vpop.trf.xlu0 }
 0x73c   : > { %v1468_v63 = vpop.trf.xlu1 }
 0x73d   : > { %v1516_v3 = vcombine.low %v1404_v54, %v1468_v63  ;;  %v1517_v4 = vcombine.high %v1404_v54, %v1468_v63 }
 0x73f   : > { %v1524_v9 = vrot.slane %v1516_v3, %v1523_v2  ;;  %v1531_v10 = vrot.slane %v1517_v4, %v1523_v2 }
 0x740   : > { %v1500_v5 = vpop.trf.xlu0 }
 0x741   : > { %v1532_v6 = vcombine.low %v1436_v58, %v1500_v5  ;;  %v1533_v7 = vcombine.high %v1436_v58, %v1500_v5 }
 0x743   : > { %v1540_v11 = vrot.slane %v1532_v6, %v1523_v2  ;;  %v1547_v12 = vrot.slane %v1533_v7, %v1523_v2 }
 0x745   : > { %v1548_v14 = vcombine.low %v1524_v9, %v1540_v11  ;;  %v1549_v15 = vcombine.high %v1524_v9, %v1540_v11  ;;  %v1564_v16 = vcombine.low %v1531_v10, %v1547_v12  ;;  %v1565_v17 = vcombine.high %v1531_v10, %v1547_v12 }
 0x747   : > { %v1556_v20 = vrot.slane %v1548_v14, %v1555_v8  ;;  %v1563_v21 = vrot.slane %v1549_v15, %v1555_v8  ;;  %v1572_v22 = vrot.slane %v1564_v16, %v1555_v8  ;;  %v1579_v23 = vrot.slane %v1565_v17, %v1555_v8 }
 0x749   : > { %v1584_v25 = vcombine.low %v1556_v20, %v1563_v21  ;;  %v1858_v26 = vcombine.high %v1556_v20, %v1563_v21  ;;  %v1600_v27 = vcombine.low %v1572_v22, %v1579_v23  ;;  %v1859_v28 = vcombine.high %v1572_v22, %v1579_v23 }
 0x74b   : > { %v1591_v29 = vrot.slane %v1584_v25, %v1523_v2  ;;  %v1599_v30 = vrot.slane %v1858_v26, %v1523_v2  ;;  %v1607_v31 = vrot.slane %v1600_v27, %v1523_v2  ;;  %v1615_v32 = vrot.slane %v1859_v28, %v1523_v2 }
 0x74d   : > { %v1617_v33 = vcombine.high %v1591_v29, %v1599_v30  ;;  %v1633_v34 = vcombine.high %v1607_v31, %v1615_v32  ;;  %v1616_v35 = vcombine.low %v1591_v29, %v1599_v30  ;;  %v1632_v36 = vcombine.low %v1607_v31, %v1615_v32 }
 0x74f   : > { %v1631_v37 = vrot.slane %v1617_v33, %v1555_v8  ;;  %v1647_v38 = vrot.slane %v1633_v34, %v1555_v8  ;;  %v1624_v39 = vrot.slane %v1616_v35, %v1555_v8  ;;  %v1640_v40 = vrot.slane %v1632_v36, %v1555_v8 }
 0x751   : > { %v1650_v41 = vcombine.low %v1631_v37, %v1647_v38  ;;  %v1649_v42 = vcombine.high %v1624_v39, %v1640_v40  ;;  %v1648_v43 = vcombine.low %v1624_v39, %v1640_v40  ;;  %v1651_v44 = vcombine.high %v1631_v37, %v1647_v38 }
 0x753   : > { %1657 = vrot.lane.b32.xlu0 %v1650_v41, %s2067_s13  ;;  %1653 = vrot.lane.b32.xlu1 %v1649_v42, %s2068_s14 }
 0x757   : > { %1661 = vrot.lane.b32.xlu1 %v1651_v44, %s2069_s15 }
 0x7c5   : > { %v1654_v45 = vpop.permute.xlu1 %1653  ;;  %v1658_v46 = vpop.permute.xlu0 %1657 }
 0x7c6   : > { %v1664_v47 = vsel %vm603_vm4, %v1648_v43, %v1654_v45 }
 0x7c7   : > { %v1666_v49 = vsel %vm1665_vm5, %v1664_v47, %v1658_v46 }
 0x7c9   : > { %v1662_v48 = vpop.permute.xlu1 %1661 }
 0x7ca   : > { %v1668_v50 = vsel %vm1667_vm6, %v1666_v49, %v1662_v48 }
 0x7cb   : > { %1950 = vmatmul.mubr.msk.f32.vlgmr.msra.gmra.mrb[8].mxu1 %vm334_vm0, %v1668_v50 }
 0x89e   : > { %v1749_v52 = vpop.f32.mrb[8].mxu1 }
 0x89f   : > { %v1750_v13 = vadd.f32 %v1860_v51, %v1749_v52  ;;  %v1951_v53 = vpop.f32.mrb[9].mxu1 }
 0x8a1   : > { %v1753_v54 = vadd.f32 %v1750_v13, %v2168_v0 }
 0x8a3   : > { %1754 = vst.msk [vmem:[%s330_s20] sm:$0xff] %vm334_vm0, %v1753_v54 }
 0x8a4 PF: > { %s19_s27 = sadd.s32 1, %s2054_s27  }
 0x8a5   : > { %p16_p2 = scmp.ge.s32.totalorder %s19_s27, 4  }
 0x8a7   :  { %18 = sbr.rel (!%p16_p2) target bundleno = 1 (0x1), region = 90 }
 0x8ae   :  { %1774 = vsyncpa [#allocation3], 1 }
 0x8af   :  { %1776 = vsyncpa [#allocation3 + $0x1], 1 }

// kernel: decoder_layer_forward.4
= control target key start
LH: loop header
LB: loop body
LE: loop exit
PB: predicated region body
PF: predicated region fallthrough
CT: control target
= control target key end

     0   :  { %s2315_s17 = smov 0   ;;  %s2507_s0 = inlined_call_operand.vmem [shape: f32[2,8,32], index: 0, kind: input, shape index: {}]   ;;  %s2508_s1 = inlined_call_operand.vmem [shape: f32[2,16,32], index: 1, kind: input, shape index: {}]   ;;  %s2509_s2 = inlined_call_operand.vmem [shape: f32[2,8,16], index: 2, kind: input, shape index: {}]   ;;  %s2510_s3 = inlined_call_operand.vmem [shape: f32[1,32], index: 3, kind: input, shape index: {}]   ;;  %s2511_s4 = inlined_call_operand.vmem [shape: f32[1,32], index: 4, kind: input, shape index: {}]   ;;  %s2512_s5 = inlined_call_operand.vmem [shape: f32[32,32], index: 5, kind: input, shape index: {}]   ;;  %s2513_s6 = inlined_call_operand.vmem [shape: f32[1,32], index: 6, kind: input, shape index: {}]   ;;  %s2514_s7 = inlined_call_operand.vmem [shape: f32[32,64], index: 7, kind: input, shape index: {}]   ;;  %s2515_s8 = inlined_call_operand.vmem [shape: f32[1,64], index: 8, kind: input, shape index: {}]   ;;  %s2516_s9 = inlined_call_operand.vmem [shape: f32[32,32], index: 9, kind: input, shape index: {}]   ;;  %s2517_s10 = inlined_call_operand.vmem [shape: f32[1,32], index: 10, kind: input, shape index: {}]   ;;  %s2518_s11 = inlined_call_operand.vmem [shape: f32[2,8,32], index: 11, kind: output, shape index: {}]  }
   0x1 LB: > { %s2034_s18 = sadd.s32 4294967295, %s2241_s17   ;;  %p2038_p0 = scmp.ge.s32.totalorder %s2241_s17, 1  ;;  %s2241_s17 = sphi %s2315_s17, %s21_s17  }
   0x2   : > { %p355_p1 = scmp.lt.s32.totalorder %s2241_s17, 3 }
   0x4   : > { %p356_p2 = pnand %p2038_p0, %p355_p1 }
   0x5   : > { %p402_p3 = scmp.lt.s32.totalorder (!%p356_p2), %s2034_s18, 1  ;;  %vm424_vm0 = vcmask (!%p356_p2), 261120   ;;  %v545_v2 = vld [vmem:[%s2514_s7] sm:$0xff] (!%p356_p2)  ;;  %v546_v3 = vld [vmem:[%s2514_s7 + $0x8] sm:$0xff] (!%p356_p2)  ;;  %v547_v4 = vld [vmem:[%s2514_s7 + $0x10] sm:$0xff] (!%p356_p2)  ;;  %v2243_v18 = vmov (!%p356_p2), 0.0|0.0  }
   0x6   : > { %359 = sbr.rel (%p356_p2) target bundleno = 1995 (0x7cb), region = 64  ;;  %v2181_v5 = vpack.c.bf16 (!%p356_p2), %v546_v3, %v545_v2  ;;  %v548_v6 = vld [vmem:[%s2514_s7 + $0x18] sm:$0xff] (!%p356_p2)  ;;  %v461_v15 = vld [vmem:[%s2512_s5] sm:$0xff] (!%p356_p2)  ;;  %v462_v16 = vld [vmem:[%s2512_s5 + $0x8] sm:$0xff] (!%p356_p2)  ;;  %2175 = vmatprep.subr.bf16.mxu0 (!%p356_p2), %v2243_v18  ;;  %vm2244_vm1 = vmmov (!%p356_p2), 0   ;;  %v2245_v21 = vmov (!%p356_p2), 0.0  }
   0x7   : > { %v2185_v7 = vpack.c.bf16 (!%p356_p2), %v548_v6, %v547_v4  ;;  %v463_v17 = vld [vmem:[%s2512_s5 + $0x10] sm:$0xff] (!%p356_p2)  ;;  %v2176_v19 = vpack.c.bf16 (!%p356_p2), %v462_v16, %v461_v15  ;;  %v464_v20 = vld [vmem:[%s2512_s5 + $0x18] sm:$0xff] (!%p356_p2)  ;;  %2110 = vmatprep.mubr.msk.f32.mxu0 (!%p356_p2), %vm2244_vm1, %v2245_v21  ;;  %v2048_v23 = vld [vmem:[%s2515_s8] ss:$0 sm:$0xff] (!%p356_p2)  ;;  %s2246_s28 = smov (!%p356_p2), 120   ;;  %s2248_s30 = smov (!%p356_p2), 104  }
   0x8   : > { %2182 = vmatprep.subr.bf16.mxu1 (!%p356_p2), %v2181_v5  ;;  %v2179_v22 = vpack.c.bf16 (!%p356_p2), %v464_v20, %v463_v17  ;;  %v2044_v36 = vld [vmem:[%s2510_s3] ss:$0 sm:$0xff] (!%p356_p2)  ;;  %vm793_vm4 = vcmask (!%p356_p2), 64512   ;;  %vm1090_vm5 = vcmask (!%p356_p2), 130048   ;;  %s2249_s23 = smov (!%p356_p2), 96   ;;  %s2252_s13 = smov (!%p356_p2), 16  }
   0x9   : > { %2184 = vmatpush3.bf16.msra.mxu1 (!%p356_p2), %v2181_v5  ;;  %2177 = vmatpush3.bf16.msra.mxu0 (!%p356_p2), %v2176_v19  ;;  %v2045_v39 = vld [vmem:[%s2511_s4] ss:$0 sm:$0xff] (!%p356_p2)  ;;  %s2253_s14 = smov (!%p356_p2), 8   ;;  %vm1869_vm6 = vcmask (!%p356_p2), 195584  }
   0xa   : > { %2186 = vmatprep.subr.bf16.mxu1 (!%p356_p2), %v2185_v7  ;;  %2178 = vmatprep.subr.bf16.mxu0 (!%p356_p2), %v2243_v18  ;;  %v2046_v50 = vld [vmem:[%s2513_s6] ss:$0 sm:$0xff] (!%p356_p2) }
   0xd   : > { %s2520_s18 = smov (!%p402_p3, %s2034_s18), 1  ;;  %2188 = vmatpush3.bf16.msra.mxu1 %v2185_v7  ;;  %2180 = vmatpush3.bf16.msra.mxu0 %v2179_v22 }
   0xe   : > { %s2323_s19 = sshll.u32 %s2520_s18, 3  ;;  %s2069_s29 = sshll.u32 %s2520_s18, 4  ;;  %2124 = vmatprep.subr.mxu1 %v2245_v21  ;;  %2134 = vmatprep.subr.mxu0 %v2245_v21 }
   0xf   : > { %s405_s22 = scalar_lea.vmem %s2507_s0, %s2323_s19  ;;  %s410_s15 = scalar_lea.vmem %s2508_s1, %s2069_s29 }
  0x10   : > { %v2329_v0 = vld [vmem:[%s405_s22] sm:$0xff]  ;;  %v421_v9 = vld [vmem:[%s410_s15 + $0x8] sm:$0xff]  ;;  %s2247_s29 = smov 112   ;;  %s414_s22 = scalar_lea.vmem %s2509_s2, %s2323_s19 }
  0x11   : > { %v425_v1 = vsel %vm424_vm0, %v2329_v0, 0.0  ;;  %v420_v8 = vld [vmem:[%s410_s15] sm:$0xff]  ;;  %s2254_s15 = smov 24  }
  0x12   : > { %426 = vadd.xlane.f32.xlu0 %v425_v1  ;;  %2121 = vmatprep.mubr.msk.f32.mxu1 %vm424_vm0, %v420_v8  ;;  %v637_v60 = vld [vmem:[%s414_s22] sm:$0xff]  ;;  %s418_s22 = scalar_lea.vmem %s2518_s11, %s2323_s19 }
  0x13   : > { %2122 = vmatmul.mubr.msk.f32.vlgmr.msra.gmra.mrb[0].mxu1 %vm424_vm0, %v421_v9 }
  0x14   : > { %2126 = vmatprep.mubr.msk.f32.mxu1 %vm2244_vm1, %v2245_v21 }
  0x9f   : > { %v427_v10 = vpop.xlane.xlu0 %426 }
  0xa0   : > { %v429_v11 = vmul.f32 0.03125, %v427_v10 }
  0xa2   : > { %v430_v12 = vsub.f32 %v2329_v0, %v429_v11 }
  0xa4   : > { %v431_v13 = vmul.f32 %v430_v12, %v430_v12  ;;  %v450_v37 = vmul.f32 %v2044_v36, %v430_v12 }
  0xa6   : > { %v432_v14 = vsel %vm424_vm0, %v431_v13, 0.0 }
  0xa7   : > { %433 = vadd.xlane.f32.xlu0 %v432_v14 }
  0xe6   : > { %v2123_v24 = vpop.f32.mrb[0].mxu1 }
  0xe7   : > { %v2375_v25 = vadd.f32 %v2123_v24, %v2048_v23  ;;  %v628_v26 = vpop.f32.mrb[1].mxu1 }
  0xe8   : > { %v2377_v27 = vadd.f32 %v2048_v23, %v628_v26 }
  0xe9   : > { %649 = vrot.lane.b32.xlu1 %v2375_v25, %s2246_s28 }
  0xea   : > { %653 = vrot.lane.b32.xlu0 %v2377_v27, %s2247_s29 }
  0xed   : > { %647 = vrot.lane.b32.xlu1 %v2377_v27, %s2246_s28 }
  0xf1   : > { %655 = vrot.lane.b32.xlu1 %v2375_v25, %s2247_s29 }
  0xf5   : > { %661 = vrot.lane.b32.xlu1 %v2375_v25, %s2248_s30 }
  0xf9   : > { %659 = vrot.lane.b32.xlu1 %v2377_v27, %s2248_s30 }
 0x108   : > { %665 = vxpose.xlu0.b32.start [1/2] (short) (narrow) %v2377_v27, 8 }
 0x10c   : > { %666 = vxpose.xlu0.b32.end [2/2] (short) (narrow) %v2375_v25, 8 }
 0x134   : > { %v434_v28 = vpop.xlane.xlu0 %433 }
 0x135   : > { %v436_v29 = vmul.f32 0.032258064, %v434_v28 }
 0x137   : > { %2215 = vrsqrt.f32 %v436_v29  ;;  %vm439_vm2 = vcmp.eq.f32.partialorder %v436_v29, inf  ;;  %v442_v32 = vand.u32 2147483648, %v436_v29  ;;  %vm441_vm3 = vcmp.eq.f32.partialorder %v436_v29, 0.0 }
 0x141   : > { %v2216_v30 = vpop.eup %2215 }
 0x142   : > { %v438_v31 = vmul.f32 %v2216_v30, %v436_v29 }
 0x144   : > { %v440_v33 = vsel %vm439_vm2, %v436_v29, %v438_v31 }
 0x145   : > { %v443_v34 = vsel %vm441_vm3, %v442_v32, %v440_v33 }
 0x146   : > { %v451_v35 = vadd.f32 1e-06, %v443_v34 }
 0x148   : > { %2217 = vrcp.f32 %v451_v35 }
 0x152   : > { %v2218_v38 = vpop.eup %2217 }
 0x153   : > { %v453_v40 = vmul.f32 %v2218_v38, %v450_v37 }
 0x155   : > { %v460_v41 = vadd.f32 %v2045_v39, %v453_v40 }
 0x157   : > { %2111 = vmatmul.mubr.msk.f32.vlgmr.msra.gmra.mrb[0].mxu0 %vm424_vm0, %v460_v41 }
 0x158   : > { %2136 = vmatprep.mubr.msk.f32.mxu0 %vm2244_vm1, %v2245_v21 }
 0x15b   : > { %v2402_v42 = vpop.permute.xlu1 %649 }
 0x15c   : > { %v2404_v43 = vpop.permute.xlu0 %653 }
 0x15d   : > { %729 = vxpose.xlu0.b32.start [1/2] (short) (narrow) %v2404_v43, 8 }
 0x15f   : > { %v2407_v44 = vpop.permute.xlu1 %647 }
 0x163   : > { %v2409_v45 = vpop.permute.xlu1 %655 }
 0x164   : > { %730 = vxpose.xlu0.b32.end [2/2] (short) (narrow) %v2409_v45, 8 }
 0x167   : > { %v2413_v47 = vpop.permute.xlu1 %661 }
 0x16b   : > { %v2415_v48 = vpop.permute.xlu1 %659 }
 0x16c   : > { %761 = vxpose.xlu0.b32.start [1/2] (short) (narrow) %v2415_v48, 8 }
 0x170   : > { %762 = vxpose.xlu0.b32.end [2/2] (short) (narrow) %v2413_v47, 8 }
 0x188   : > { %v681_v46 = vpop.trf.xlu0 }
 0x189   : > { %2125 = vmatpush3.msra.mxu1 %v681_v46 }
 0x18a   : > { %2129 = vmatprep.subr.mxu1 %v2245_v21 }
 0x1e0   : > { %v745_v49 = vpop.trf.xlu0 }
 0x1e1   : > { %2135 = vmatpush3.msra.mxu0 %v745_v49 }
 0x1e2   : > { %2144 = vmatprep.subr.mxu0 %v2245_v21 }
 0x1ec   : > { %v777_v58 = vpop.trf.xlu0 }
 0x22a   : > { %v541_v51 = vpop.f32.mrb[0].mxu0 }
 0x22b   : > { %v542_v52 = vadd.f32 %v2046_v50, %v541_v51  ;;  %v2112_v53 = vpop.f32.mrb[1].mxu0 }
 0x22d   : > { %639 = vrot.lane.b32.xlu1 %v542_v52, %s2246_s28  ;;  %2127 = vmatmul.mubr.msk.f32.vlgmr.msra.gmra.mrb[2].mxu1 %vm793_vm4, %v542_v52 }
 0x22e   : > { %2131 = vmatprep.mubr.msk.f32.mxu1 %vm2244_vm1, %v2245_v21 }
 0x231   : > { %641 = vrot.lane.b32.xlu1 %v542_v52, %s2247_s29 }
 0x235   : > { %643 = vrot.lane.b32.xlu1 %v542_v52, %s2248_s30 }
 0x25e   : > { %697 = vxpose.xlu1.b32.start [1/2] (short) (narrow) %v2407_v44, 8 }
 0x262   : > { %698 = vxpose.xlu1.b32.end [2/2] (short) (narrow) %v2402_v42, 8 }
 0x29f   : > { %v640_v54 = vpop.permute.xlu1 %639 }
 0x2a3   : > { %v642_v55 = vpop.permute.xlu1 %641 }
 0x2a4   : > { %2137 = vmatmul.mubr.msk.f32.vlgmr.msra.gmra.mrb[2].mxu0 %vm793_vm4, %v642_v55 }
 0x2a5   : > { %2146 = vmatprep.mubr.msk.f32.mxu0 %vm2244_vm1, %v2245_v21 }
 0x2a7   : > { %v644_v56 = vpop.permute.xlu1 %643 }
 0x2de   : > { %v713_v57 = vpop.trf.xlu1 }
 0x2df   : > { %2130 = vmatpush3.msra.mxu1 %v713_v57 }
 0x2e0   : > { %2132 = vmatmul.mubr.msk.f32.vlgmr.msra.gmra.mrb[4].mxu1 %vm793_vm4, %v640_v54  ;;  %2139 = vmatprep.subr.mxu1 %v2245_v21 }
 0x2e1   : > { %2140 = vmatpush3.msra.mxu1 %v777_v58  ;;  %2141 = vmatprep.mubr.msk.f32.mxu1 %vm2244_vm1, %v2245_v21 }
 0x2e2   : > { %2149 = vmatprep.subr.mxu1 %v2245_v21 }
 0x2e4   : > { %2142 = vmatmul.mubr.msk.f32.vlgmr.msra.gmra.mrb[6].mxu1 %vm793_vm4, %v644_v56 }
 0x2e5   : > { %2151 = vmatprep.mubr.msk.f32.mxu1 %vm2244_vm1, %v2245_v21 }
 0x300   : > { %v862_v59 = vpop.f32.mrb[2].mxu1 }
 0x301   : > { %v1082_v61 = vmul.f32 0.35355338, %v862_v59  ;;  %v2128_v62 = vpop.f32.mrb[3].mxu1 }
 0x303   : > { %v1086_v63 = vadd.f32 %v1082_v61, %v637_v60 }
 0x305   : > { %v1091_v1 = vsel %vm1090_vm5, %v1086_v63, -inf }
 0x306   : > { %1092 = vmax.xlane.f32.xlu1 %v1091_v1 }
 0x377   : > { %v1006_v2 = vpop.f32.mrb[2].mxu0 }
 0x378   : > { %v1084_v3 = vmul.f32 0.35355338, %v1006_v2  ;;  %v2138_v4 = vpop.f32.mrb[3].mxu0 }
 0x37a   : > { %v1088_v5 = vadd.f32 %v1084_v3, %v637_v60 }
 0x37c   : > { %v1097_v6 = vsel %vm1090_vm5, %v1088_v5, -inf }
 0x37d   : > { %1098 = vmax.xlane.f32.xlu1 %v1097_v6 }
 0x393   : > { %v1093_v17 = vpop.xlane.xlu1 %1092 }
 0x394   : > { %v1103_v19 = vsub.f32 %v1086_v63, %v1093_v17 }
 0x396   : > { %v1107_v20 = vmul.f32 1.442695, %v1103_v19 }
 0x398   : > { %2219 = vpow2.f32 %v1107_v20 }
 0x3a2   : > { %v2220_v22 = vpop.eup %2219 }
 0x3a3   : > { %v1115_v23 = vsel %vm1090_vm5, %v2220_v22, 0.0 }
 0x3b3   : > { %v934_v7 = vpop.f32.mrb[4].mxu1 }
 0x3b4   : > { %v1083_v8 = vmul.f32 0.35355338, %v934_v7  ;;  %v2133_v9 = vpop.f32.mrb[5].mxu1 }
 0x3b6   : > { %v1087_v10 = vadd.f32 %v1083_v8, %v637_v60  ;;  %v1871_v8 = vld [vmem:[%s2516_s9] sm:$0xff] }
 0x3b7   : > { %v1078_v11 = vpop.f32.mrb[6].mxu1 }
 0x3b8   : > { %v1085_v12 = vmul.f32 0.35355338, %v1078_v11  ;;  %v2143_v13 = vpop.f32.mrb[7].mxu1  ;;  %v1094_v14 = vsel %vm1090_vm5, %v1087_v10, -inf }
 0x3b9   : > { %1095 = vmax.xlane.f32.xlu0 %v1094_v14  ;;  %v2251_v14 = vmov 1934713408  }
 0x3ba   : > { %v1089_v15 = vadd.f32 %v1085_v12, %v637_v60  ;;  %v1724_v12 = vlaneseq }
 0x3bc   : > { %v1100_v16 = vsel %vm1090_vm5, %v1089_v15, -inf  ;;  %v1725_v17 = vshrl.u32 %v1724_v12, 7 }
 0x3bd   : > { %1101 = vmax.xlane.f32.xlu1 %v1100_v16 }
 0x3ce   : > { %1135 = vrot.lane.b32.xlu1 %v2377_v27, %s2249_s23 }
 0x3cf   : > { %1139 = vrot.lane.b32.xlu0 %v2407_v44, %s2249_s23 }
 0x3d2   : > { %1137 = vrot.lane.b32.xlu1 %v2375_v25, %s2249_s23 }
 0x3d3   : > { %1143 = vrot.lane.b32.xlu0 %v2404_v43, %s2249_s23 }
 0x3d6   : > { %1141 = vrot.lane.b32.xlu1 %v2402_v42, %s2249_s23 }
 0x3d7   : > { %1145 = vrot.lane.b32.xlu0 %v2409_v45, %s2249_s23 }
 0x3da   : > { %1147 = vrot.lane.b32.xlu1 %v2415_v48, %s2249_s23 }
 0x3de   : > { %1149 = vrot.lane.b32.xlu1 %v2413_v47, %s2249_s23 }
 0x3f6   : > { %1116 = vadd.xlane.f32.xlu0 %v1115_v23 }
 0x40a   : > { %v1099_v24 = vpop.xlane.xlu1 %1098 }
 0x40b   : > { %v1105_v25 = vsub.f32 %v1088_v5, %v1099_v24 }
 0x40d   : > { %v1111_v26 = vmul.f32 1.442695, %v1105_v25 }
 0x40f   : > { %2221 = vpow2.f32 %v1111_v26 }
 0x419   : > { %v2222_v27 = vpop.eup %2221 }
 0x41a   : > { %v1121_v28 = vsel %vm1090_vm5, %v2222_v27, 0.0 }
 0x41b   : > { %1122 = vadd.xlane.f32.xlu0 %v1121_v28 }
 0x446   : > { %v1096_v29 = vpop.xlane.xlu0 %1095 }
 0x447   : > { %v1104_v30 = vsub.f32 %v1087_v10, %v1096_v29  ;;  %v2250_v10 = vmov 1983009808  }
 0x448   : > { %v1722_v11 = vunpack.c.l.s4 %v2250_v10 }
 0x449   : > { %v1109_v31 = vmul.f32 1.442695, %v1104_v30 }
 0x44a   : > { %v1102_v32 = vpop.xlane.xlu1 %1101  ;;  %v1140_v39 = vpop.permute.xlu0 %1139  ;;  %v1723_v16 = vunpack.c.0.s8 %v1722_v11 }
 0x44b   : > { %2223 = vpow2.f32 %v1109_v31  ;;  %v1106_v33 = vsub.f32 %v1089_v15, %v1102_v32  ;;  %v1754_v15 = vunpack.c.l.s4 %v2251_v14 }
 0x44c   : > { %v1726_v23 = vsub.s32 %v1723_v16, %v1725_v17 }
 0x44d   : > { %v1113_v34 = vmul.f32 1.442695, %v1106_v33 }
 0x44e   : > { %v1144_v40 = vpop.permute.xlu0 %1143  ;;  %v1136_v41 = vpop.permute.xlu1 %1135 }
 0x44f   : > { %2225 = vpow2.f32 %v1113_v34 }
 0x452   : > { %v1146_v42 = vpop.permute.xlu0 %1145  ;;  %v1138_v43 = vpop.permute.xlu1 %1137 }
 0x455   : > { %v2224_v35 = vpop.eup %2223 }
 0x456   : > { %v1118_v36 = vsel %vm1090_vm5, %v2224_v35, 0.0  ;;  %v1142_v45 = vpop.permute.xlu1 %1141 }
 0x457   : > { %1119 = vadd.xlane.f32.xlu1 %v1118_v36 }
 0x459   : > { %v2226_v37 = vpop.eup %2225 }
 0x45a   : > { %v1124_v38 = vsel %vm1090_vm5, %v2226_v37, 0.0  ;;  %v1148_v47 = vpop.permute.xlu1 %1147 }
 0x45b   : > { %1125 = vadd.xlane.f32.xlu0 %v1124_v38  ;;  %v1874_v38 = vld [vmem:[%s2516_s9 + $0x18] sm:$0xff] }
 0x45e   : > { %v1150_v49 = vpop.permute.xlu1 %1149 }
 0x483   : > { %v1117_v44 = vpop.xlane.xlu0 %1116 }
 0x484   : > { %2227 = vrcp.f32 %v1117_v44 }
 0x488   : > { %1191 = vxpose.xlu0.b32.start [1/2] (short) (narrow) %v1140_v39, 8 }
 0x48a   : > { %1159 = vxpose.xlu1.b32.start [1/2] (short) (narrow) %v1136_v41, 8 }
 0x48c   : > { %1192 = vxpose.xlu0.b32.end [2/2] (short) (narrow) %v1142_v45, 8 }
 0x48e   : > { %v2228_v46 = vpop.eup %2227  ;;  %1160 = vxpose.xlu1.b32.end [2/2] (short) (narrow) %v1138_v43, 8 }
 0x48f   : > { %v1128_v48 = vmul.f32 %v2228_v46, %v2220_v22  ;;  %v1755_v22 = vunpack.c.0.s8 %v1754_v15 }
 0x490   : > { %1223 = vxpose.xlu0.b32.start [1/2] (short) (narrow) %v1144_v40, 8 }
 0x491   : > { %2145 = vmatpush3.xpose.msk.msra.mxu0 %vm1090_vm5, %v1128_v48  ;;  %v1758_v29 = vsub.s32 %v1755_v22, %v1725_v17 }
 0x492   : > { %1255 = vxpose.xlu1.b32.start [1/2] (short) (narrow) %v1148_v47, 8  ;;  %2154 = vmatprep.subr.mxu0 %v2245_v21 }
 0x494   : > { %1224 = vxpose.xlu0.b32.end [2/2] (short) (narrow) %v1146_v42, 8 }
 0x496   : > { %1256 = vxpose.xlu1.b32.end [2/2] (short) (narrow) %v1150_v49, 8 }
 0x4a8   : > { %v1123_v53 = vpop.xlane.xlu0 %1122 }
 0x4e4   : > { %v1120_v50 = vpop.xlane.xlu1 %1119 }
 0x4e5   : > { %2229 = vrcp.f32 %v1120_v50 }
 0x4e8   : > { %v1126_v54 = vpop.xlane.xlu0 %1125 }
 0x4e9   : > { %2231 = vrcp.f32 %v1126_v54 }
 0x4ea   : > { %2233 = vrcp.f32 %v1123_v53 }
 0x4ef   : > { %v2230_v51 = vpop.eup %2229 }
 0x4f0   : > { %v1130_v52 = vmul.f32 %v2230_v51, %v2224_v35 }
 0x4f2   : > { %2150 = vmatpush3.xpose.msk.msra.mxu1 %vm1090_vm5, %v1130_v52 }
 0x4f3   : > { %2159 = vmatprep.subr.mxu1 %v2245_v21  ;;  %v2232_v55 = vpop.eup %2231 }
 0x4f4   : > { %v2234_v56 = vpop.eup %2233  ;;  %v1134_v57 = vmul.f32 %v2232_v55, %v2226_v37  ;;  %v1873_v37 = vld [vmem:[%s2516_s9 + $0x10] sm:$0xff] }
 0x4f5   : > { %v1132_v59 = vmul.f32 %v2234_v56, %v2222_v27  ;;  %v2193_v43 = vpack.c.bf16 %v1874_v38, %v1873_v37 }
 0x508   : > { %v1207_v58 = vpop.trf.xlu0 }
 0x509   : > { %2152 = vmatmul.mubr.msk.f32.vlgmr.msra.gmra.mrb[8].mxu1 %vm1090_vm5, %v1207_v58 }
 0x50a   : > { %2160 = vmatpush3.xpose.msk.msra.mxu1 %vm1090_vm5, %v1134_v57  ;;  %v1175_v60 = vpop.trf.xlu1  ;;  %2161 = vmatprep.mubr.msk.f32.mxu1 %vm2244_vm1, %v2245_v21 }
 0x50b   : > { %2147 = vmatmul.mubr.msk.f32.vlgmr.msra.gmra.mrb[4].mxu0 %vm1090_vm5, %v1175_v60 }
 0x50c   : > { %2155 = vmatpush3.xpose.msk.msra.mxu0 %vm1090_vm5, %v1132_v59  ;;  %2156 = vmatprep.mubr.msk.f32.mxu0 %vm2244_vm1, %v2245_v21 }
 0x50d   : > { %2189 = vmatprep.subr.bf16.mxu0 %v2243_v18 }
 0x510   : > { %v1239_v61 = vpop.trf.xlu0 }
 0x511   : > { %2157 = vmatmul.mubr.msk.f32.vlgmr.msra.gmra.mrb[6].mxu0 %vm1090_vm5, %v1239_v61 }
 0x512   : > { %v1271_v62 = vpop.trf.xlu1  ;;  %2172 = vmatprep.mubr.msk.f32.mxu0 %vm2244_vm1, %v2245_v21  ;;  %v1872_v21 = vld [vmem:[%s2516_s9 + $0x8] sm:$0xff] }
 0x513   : > { %2162 = vmatmul.mubr.msk.f32.vlgmr.msra.gmra.mrb[10].mxu1 %vm1090_vm5, %v1271_v62  ;;  %v2190_v9 = vpack.c.bf16 %v1872_v21, %v1871_v8 }
 0x515   : > { %2191 = vmatpush3.bf16.msra.mxu0 %v2190_v9 }
 0x516   : > { %2192 = vmatprep.subr.bf16.mxu0 %v2243_v18 }
 0x519   : > { %2194 = vmatpush3.bf16.msra.mxu0 %v2193_v43 }
 0x5dc   : > { %v1435_v63 = vpop.f32.mrb[8].mxu1 }
 0x5dd   : > { %v2153_v1 = vpop.f32.mrb[9].mxu1 }
 0x5de   : > { %v1359_v2 = vpop.f32.mrb[4].mxu0 }
 0x5df   : > { %1591 = vxpose.xlu0.b32.start.end [1/1] (short) (narrow) %v1359_v2, 8  ;;  %v2148_v3 = vpop.f32.mrb[5].mxu0 }
 0x5e3   : > { %1623 = vxpose.xlu0.b32.start.end [1/1] (short) (narrow) %v1435_v63, 8 }
 0x5e4   : > { %v1511_v4 = vpop.f32.mrb[6].mxu0 }
 0x5e5   : > { %1655 = vxpose.xlu1.b32.start.end [1/1] (short) (narrow) %v1511_v4, 8  ;;  %v2158_v5 = vpop.f32.mrb[7].mxu0 }
 0x5e6   : > { %v1587_v6 = vpop.f32.mrb[10].mxu1 }
 0x5e7   : > { %1687 = vxpose.xlu0.b32.start.end [1/1] (short) (narrow) %v1587_v6, 8  ;;  %v2163_v7 = vpop.f32.mrb[11].mxu1 }
 0x5e8   : > { %v2065_v7 = vld [vmem:[%s2517_s10] ss:$0 sm:$0xff] }
 0x65f   : > { %v1607_v13 = vpop.trf.xlu0 }
 0x663   : > { %v1639_v19 = vpop.trf.xlu0 }
 0x665   : > { %v1671_v20 = vpop.trf.xlu1 }
 0x666   : > { %v1719_v24 = vcombine.low %v1607_v13, %v1671_v20  ;;  %v1720_v25 = vcombine.high %v1607_v13, %v1671_v20 }
 0x667   : > { %v1703_v26 = vpop.trf.xlu0 }
 0x668   : > { %v1735_v27 = vcombine.low %v1639_v19, %v1703_v26  ;;  %v1736_v28 = vcombine.high %v1639_v19, %v1703_v26  ;;  %v1727_v30 = vrot.slane %v1719_v24, %v1726_v23  ;;  %v1734_v18 = vrot.slane %v1720_v25, %v1726_v23 }
 0x66a   : > { %v1743_v31 = vrot.slane %v1735_v27, %v1726_v23  ;;  %v1750_v32 = vrot.slane %v1736_v28, %v1726_v23 }
 0x66c   : > { %v1751_v33 = vcombine.low %v1727_v30, %v1743_v31  ;;  %v1752_v34 = vcombine.high %v1727_v30, %v1743_v31  ;;  %v1767_v35 = vcombine.low %v1734_v18, %v1750_v32  ;;  %v1768_v36 = vcombine.high %v1734_v18, %v1750_v32 }
 0x66e   : > { %v1759_v39 = vrot.slane %v1751_v33, %v1758_v29  ;;  %v1766_v40 = vrot.slane %v1752_v34, %v1758_v29  ;;  %v1775_v41 = vrot.slane %v1767_v35, %v1758_v29  ;;  %v1782_v42 = vrot.slane %v1768_v36, %v1758_v29 }
 0x670   : > { %v1787_v44 = vcombine.low %v1759_v39, %v1766_v40  ;;  %v2063_v45 = vcombine.high %v1759_v39, %v1766_v40  ;;  %v1803_v46 = vcombine.low %v1775_v41, %v1782_v42  ;;  %v2064_v47 = vcombine.high %v1775_v41, %v1782_v42 }
 0x672   : > { %v1794_v48 = vrot.slane %v1787_v44, %v1726_v23  ;;  %v1802_v49 = vrot.slane %v2063_v45, %v1726_v23  ;;  %v1810_v50 = vrot.slane %v1803_v46, %v1726_v23  ;;  %v1818_v51 = vrot.slane %v2064_v47, %v1726_v23 }
 0x674   : > { %v1820_v52 = vcombine.high %v1794_v48, %v1802_v49  ;;  %v1836_v53 = vcombine.high %v1810_v50, %v1818_v51  ;;  %v1819_v54 = vcombine.low %v1794_v48, %v1802_v49  ;;  %v1835_v55 = vcombine.low %v1810_v50, %v1818_v51 }
 0x676   : > { %v1834_v56 = vrot.slane %v1820_v52, %v1758_v29  ;;  %v1850_v57 = vrot.slane %v1836_v53, %v1758_v29  ;;  %v1827_v58 = vrot.slane %v1819_v54, %v1758_v29  ;;  %v1843_v59 = vrot.slane %v1835_v55, %v1758_v29 }
 0x678   : > { %v1853_v60 = vcombine.low %v1834_v56, %v1850_v57  ;;  %v1852_v61 = vcombine.high %v1827_v58, %v1843_v59  ;;  %v1851_v62 = vcombine.low %v1827_v58, %v1843_v59  ;;  %v1854_v63 = vcombine.high %v1834_v56, %v1850_v57 }
 0x67a   : > { %1860 = vrot.lane.b32.xlu0 %v1853_v60, %s2252_s13  ;;  %1856 = vrot.lane.b32.xlu1 %v1852_v61, %s2253_s14 }
 0x67e   : > { %1864 = vrot.lane.b32.xlu1 %v1854_v63, %s2254_s15 }
 0x6ec   : > { %v1857_v1 = vpop.permute.xlu1 %1856  ;;  %v1861_v2 = vpop.permute.xlu0 %1860 }
 0x6ed   : > { %v1867_v3 = vsel %vm793_vm4, %v1851_v62, %v1857_v1 }
 0x6ee   : > { %v1868_v5 = vsel %vm1090_vm5, %v1867_v3, %v1861_v2 }
 0x6f0   : > { %v1865_v4 = vpop.permute.xlu1 %1864 }
 0x6f1   : > { %v1870_v6 = vsel %vm1869_vm6, %v1868_v5, %v1865_v4 }
 0x6f2   : > { %2173 = vmatmul.mubr.msk.f32.vlgmr.msra.gmra.mrb[8].mxu0 %vm424_vm0, %v1870_v6 }
 0x7c5   : > { %v1951_v8 = vpop.f32.mrb[8].mxu0 }
 0x7c6   : > { %v1952_v21 = vadd.f32 %v2065_v7, %v1951_v8  ;;  %v2174_v9 = vpop.f32.mrb[9].mxu0 }
 0x7c8   : > { %v1955_v10 = vadd.f32 %v1952_v21, %v2329_v0 }
 0x7ca   : > { %1956 = vst.msk [vmem:[%s418_s22] sm:$0xff] %vm424_vm0, %v1955_v10 }
 0x7cb PF: > { %s21_s17 = sadd.s32 1, %s2241_s17  }
 0x7cc   : > { %p18_p4 = scmp.ge.s32.totalorder %s21_s17, 4  }
 0x7ce   :  { %20 = sbr.rel (!%p18_p4) target bundleno = 1 (0x1), region = 100 }

</bundles_post_ra>
